<compile_context>
chip_gen: v7x
topology: tpu7x:2x2x1
jax: 0.10.0
libtpu: 0.0.40
codegen_flags: <defaults>
</compile_context>

<pallas_src>
import jax
import jax.numpy as jnp
from jax import lax
from jax.experimental import pallas as pl
from jax.experimental.pallas import tpu as pltpu


def _round_up(x, m):
    return ((x + m - 1) // m) * m


# Explicit scoped-VMEM budget: above the v5e 16 MiB default, within v7x's
# 64 MiB per-TensorCore physical VMEM, far above this kernel's ~2-4 MiB need.
_VMEM_LIMIT_BYTES = 32 * 1024 * 1024


# ---------------------------------------------------------------------------
# SAGEConv layer: h = relu( [A@x | x] @ [Wl; Wr] + b )
# grid = (row tiles i, reduction tiles k); acc scratch carries A@x across k.
# ---------------------------------------------------------------------------
def _sage_kernel(a_ref, xk_ref, xi_ref, w_ref, b_ref, out_ref, acc_ref):
    k = pl.program_id(1)

    @pl.when(k == 0)
    def _():
        acc_ref[...] = jnp.zeros_like(acc_ref)

    # Partial mean-aggregation (A @ x) over the neighbor k-tiles, f32 acc.
    acc_ref[...] += jnp.dot(a_ref[...], xk_ref[...],
                            preferred_element_type=jnp.float32)

    @pl.when(k == pl.num_programs(1) - 1)
    def _():
        # Fused epilogue: single K=2*f_in matmul of [A@x | x] @ [Wl; Wr].
        cat = jnp.concatenate(
            [acc_ref[...].astype(jnp.bfloat16), xi_ref[...]], axis=1)
        h = jnp.dot(cat, w_ref[...], preferred_element_type=jnp.float32)
        h = h + b_ref[...]                      # bias/ReLU epilogue stays f32
        out_ref[...] = jnp.maximum(h, 0.0).astype(out_ref.dtype)


def sage_layer(a, x, w_cat, b, *, tile_m, tile_k):
    n_pad, f_in = x.shape
    h_out = w_cat.shape[1]
    grid = (n_pad // tile_m, n_pad // tile_k)
    return pl.pallas_call(
        _sage_kernel,
        out_shape=jax.ShapeDtypeStruct((n_pad, h_out), jnp.bfloat16),
        grid_spec=pltpu.PrefetchScalarGridSpec(
            num_scalar_prefetch=0,
            grid=grid,
            in_specs=[
                pl.BlockSpec((tile_m, tile_k), lambda i, k: (i, k)),   # A tile (bf16)
                pl.BlockSpec((tile_k, f_in), lambda i, k: (k, 0)),     # x neighbor tile
                pl.BlockSpec((tile_m, f_in), lambda i, k: (i, 0)),     # x root row tile
                pl.BlockSpec((2 * f_in, h_out), lambda i, k: (0, 0)),  # [Wl; Wr]
                pl.BlockSpec((1, h_out), lambda i, k: (0, 0)),         # bias (f32)
            ],
            out_specs=pl.BlockSpec((tile_m, h_out), lambda i, k: (i, 0)),
            scratch_shapes=[pltpu.VMEM((tile_m, f_in), jnp.float32)],
        ),
        compiler_params=pltpu.CompilerParams(
            dimension_semantics=("parallel", "arbitrary"),
            vmem_limit_bytes=_VMEM_LIMIT_BYTES),
    )(a, x, x, w_cat, b)


# ---------------------------------------------------------------------------
# Edge MLP: logits = relu([h[src] | h[dst]] @ W3 + b3) @ W4 + b4
# Row gather is done per edge tile with in-register one-hot matrices
# (iota + compare) feeding the MXU -> no scalar per-edge loop, no HBM
# gather-matrix traffic.  h stays VMEM-resident in bf16.
# ---------------------------------------------------------------------------
def _edge_mlp_kernel(src_ref, dst_ref, h_ref, w3_ref, b3_ref, w4_ref, b4_ref,
                     out_ref):
    tile_e = out_ref.shape[0]
    n_pad = h_ref.shape[0]

    ids = lax.broadcasted_iota(jnp.int32, (tile_e, n_pad), 1)
    onehot_s = jnp.where(src_ref[...] == ids, 1.0, 0.0).astype(jnp.bfloat16)
    onehot_d = jnp.where(dst_ref[...] == ids, 1.0, 0.0).astype(jnp.bfloat16)

    h = h_ref[...]
    hs = jnp.dot(onehot_s, h,
                 preferred_element_type=jnp.float32).astype(jnp.bfloat16)
    hd = jnp.dot(onehot_d, h,
                 preferred_element_type=jnp.float32).astype(jnp.bfloat16)

    z_in = jnp.concatenate([hs, hd], axis=1)          # (tile_e, 2*h) -> K=256
    z = jnp.dot(z_in, w3_ref[...], preferred_element_type=jnp.float32)
    z = jnp.maximum(z + b3_ref[...], 0.0).astype(jnp.bfloat16)
    out_ref[...] = (jnp.dot(z, w4_ref[...], preferred_element_type=jnp.float32)
                    + b4_ref[...]).astype(out_ref.dtype)


def edge_mlp(h, src2d, dst2d, w3_cat, b3, w4, b4, *, tile_e=256):
    n_pad, h_dim = h.shape
    e_pad = src2d.shape[0]
    o_dim = w4.shape[1]
    grid = (e_pad // tile_e,)
    return pl.pallas_call(
        _edge_mlp_kernel,
        out_shape=jax.ShapeDtypeStruct((e_pad, o_dim), jnp.float32),
        grid_spec=pltpu.PrefetchScalarGridSpec(
            num_scalar_prefetch=0,
            grid=grid,
            in_specs=[
                pl.BlockSpec((tile_e, 1), lambda e: (e, 0)),           # src ids
                pl.BlockSpec((tile_e, 1), lambda e: (e, 0)),           # dst ids
                pl.BlockSpec((n_pad, h_dim), lambda e: (0, 0)),        # h (bf16, resident)
                pl.BlockSpec((2 * h_dim, h_dim), lambda e: (0, 0)),    # W3 (fused src|dst)
                pl.BlockSpec((1, h_dim), lambda e: (0, 0)),            # b3
                pl.BlockSpec((h_dim, o_dim), lambda e: (0, 0)),        # W4
                pl.BlockSpec((1, o_dim), lambda e: (0, 0)),            # b4
            ],
            out_specs=pl.BlockSpec((tile_e, o_dim), lambda e: (e, 0)),
        ),
        compiler_params=pltpu.CompilerParams(
            dimension_semantics=("parallel",),
            vmem_limit_bytes=_VMEM_LIMIT_BYTES),
    )(src2d, dst2d, h, w3_cat, b3, w4, b4)


# ---------------------------------------------------------------------------
# Wrapper: padding, dense mean-aggregation operator, weight prep (JAX glue).
# ---------------------------------------------------------------------------
def _pick_node_tiles(n):
    """MXU/HBM-friendly tiles (clamped for small graphs); tile_m | tile_k | n_pad."""
    n128 = _round_up(max(n, 1), 128)
    if n128 >= 512:
        tile_m, tile_k = 256, 512
    elif n128 >= 256:
        tile_m, tile_k = 256, 256
    else:
        tile_m, tile_k = 128, 128
    n_pad = _round_up(n128, tile_k)
    return n_pad, tile_m, tile_k


def edge_classifier_gnn(x, edge_index, params, *, tile_e=256):
    n, in_dim = x.shape
    src = edge_index[0].astype(jnp.int32)
    dst = edge_index[1].astype(jnp.int32)
    e = src.shape[0]

    (w1l, b1, w1r, w2l, b2, w2r, w3, b3, w4, b4) = params
    hidden = w1l.shape[0]
    out_dim = w4.shape[0]

    n_pad, tile_m, tile_k = _pick_node_tiles(n)
    e_pad = _round_up(max(e, 1), tile_e)
    f_pad = _round_up(in_dim, 128)
    h_pad = _round_up(hidden, 128)
    o_pad = _round_up(out_dim, 128)

    # Mean-aggregation operator (dst aggregates incoming src features),
    # padded to (n_pad, n_pad); bf16 for the MXU. Padded rows have deg 0 -> 0.
    a = jnp.zeros((n_pad, n_pad), jnp.float32).at[dst, src].add(1.0)
    deg = a.sum(axis=1, keepdims=True)
    a = (a / jnp.maximum(deg, 1.0)).astype(jnp.bfloat16)

    x_pad = (jnp.zeros((n_pad, f_pad), jnp.float32)
             .at[:n, :in_dim].set(x.astype(jnp.float32))
             .astype(jnp.bfloat16))

    def pad_w(w_t, rows, cols):  # w_t already [in, out]
        return (jnp.zeros((rows, cols), jnp.float32)
                .at[:w_t.shape[0], :w_t.shape[1]].set(w_t)
                .astype(jnp.bfloat16))

    def pad_b(bv, cols):
        return jnp.zeros((1, cols), jnp.float32).at[0, :bv.shape[0]].set(bv)

    # Fused [Wl; Wr] per SAGE layer (kernel multiplies [A@x | x] against it).
    w1_cat = jnp.concatenate([pad_w(w1l.T, f_pad, h_pad),
                              pad_w(w1r.T, f_pad, h_pad)], axis=0)
    b1_p = pad_b(b1, h_pad)
    w2_cat = jnp.concatenate([pad_w(w2l.T, h_pad, h_pad),
                              pad_w(w2r.T, h_pad, h_pad)], axis=0)
    b2_p = pad_b(b2, h_pad)
    # Fused W3 for the concatenated [h_src | h_dst] edge representation.
    w3_cat = jnp.concatenate([pad_w(w3[:, :hidden].T, h_pad, h_pad),
                              pad_w(w3[:, hidden:].T, h_pad, h_pad)], axis=0)
    b3_p = pad_b(b3, h_pad)
    w4_p = pad_w(w4.T, h_pad, o_pad)
    b4_p = pad_b(b4, o_pad)

    src2d = jnp.zeros((e_pad, 1), jnp.int32).at[:e, 0].set(src)
    dst2d = jnp.zeros((e_pad, 1), jnp.int32).at[:e, 0].set(dst)

    h1 = sage_layer(a, x_pad, w1_cat, b1_p, tile_m=tile_m, tile_k=tile_k)
    h2 = sage_layer(a, h1, w2_cat, b2_p, tile_m=tile_m, tile_k=tile_k)
    logits_pad = edge_mlp(h2, src2d, dst2d, w3_cat, b3_p, w4_p, b4_p,
                          tile_e=tile_e)
    return logits_pad[:e, :out_dim]


# ---------------------------------------------------------------------------
# Plain-JAX reference replicating the PyTorch / PyG forward.
# ---------------------------------------------------------------------------
def reference_forward(x, edge_index, params):
    (w1l, b1, w1r, w2l, b2, w2r, w3, b3, w4, b4) = params
    n = x.shape[0]
    src, dst = edge_index[0], edge_index[1]

    def sage(h, wl, bl, wr):
        summed = jnp.zeros((n, h.shape[1]), h.dtype).at[dst].add(h[src])
        cnt = jnp.zeros((n,), h.dtype).at[dst].add(1.0)
        mean = summed / jnp.maximum(cnt, 1.0)[:, None]
        return mean @ wl.T + bl + h @ wr.T

    h = jax.nn.relu(sage(x, w1l, b1, w1r))
    h = jax.nn.relu(sage(h, w2l, b2, w2r))
    e = jnp.concatenate([h[src], h[dst]], axis=1)
    z = jax.nn.relu(e @ w3.T + b3)
    return z @ w4.T + b4


def make_params(key, in_dim, hidden, out_dim):
    ks = jax.random.split(key, 10)
    s = 0.1
    w1l = s * jax.random.normal(ks[0], (hidden, in_dim), jnp.float32)
    b1 = s * jax.random.normal(ks[1], (hidden,), jnp.float32)
    w1r = s * jax.random.normal(ks[2], (hidden, in_dim), jnp.float32)
    w2l = s * jax.random.normal(ks[3], (hidden, hidden), jnp.float32)
    b2 = s * jax.random.normal(ks[4], (hidden,), jnp.float32)
    w2r = s * jax.random.normal(ks[5], (hidden, hidden), jnp.float32)
    w3 = s * jax.random.normal(ks[6], (hidden, 2 * hidden), jnp.float32)
    b3 = s * jax.random.normal(ks[7], (hidden,), jnp.float32)
    w4 = s * jax.random.normal(ks[8], (out_dim, hidden), jnp.float32)
    b4 = s * jax.random.normal(ks[9], (out_dim,), jnp.float32)
    return (w1l, b1, w1r, w2l, b2, w2r, w3, b3, w4, b4)


if __name__ == "__main__":
    key = jax.random.PRNGKey(0)
    k_x, k_e, k_p = jax.random.split(key, 3)

    n_nodes, in_dim, hidden, out_dim, n_edges = 16, 8, 64, 2, 24

    x = jax.random.normal(k_x, (n_nodes, in_dim), jnp.float32)
    edge_index = jax.random.randint(k_e, (2, n_edges), 0, n_nodes, dtype=jnp.int32)
    params = make_params(k_p, in_dim, hidden, out_dim)

    fwd = jax.jit(edge_classifier_gnn)
    logits = jax.block_until_ready(fwd(x, edge_index, params))

    ref = reference_forward(x, edge_index, params)
    assert logits.shape == (n_edges, out_dim)
    max_err = float(jnp.max(jnp.abs(logits - ref)))
    assert jnp.allclose(logits, ref, atol=5e-2, rtol=5e-2), f"max abs err {max_err}"
    print("KERNEL_OK")
</pallas_src>

<mosaic_0001>
module attributes {stable_mosaic.version = 11 : i64} {
  func.func @_sage_kernel(%arg0: i32, %arg1: i32, %arg2: memref<128x128xbf16, #tpu.memory_space<vmem>>, %arg3: memref<128x128xbf16, #tpu.memory_space<vmem>>, %arg4: memref<128x128xbf16, #tpu.memory_space<vmem>>, %arg5: memref<256x128xbf16, #tpu.memory_space<vmem>>, %arg6: memref<1x128xf32, #tpu.memory_space<vmem>>, %arg7: memref<128x128xbf16, #tpu.memory_space<vmem>>, %arg8: memref<128x128xf32, #tpu.memory_space<vmem>>) attributes {dimension_semantics = [#tpu.dimension_semantics<parallel>, #tpu.dimension_semantics<arbitrary>], iteration_bounds = array<i64: 1, 1>, scalar_prefetch = 0 : i64, scratch_operands = 1 : i64, tpu.core_type = #tpu.core_type<tc>, window_params = [{transform_indices = @transform_0, window_bounds = array<i64: 128, 128>}, {transform_indices = @transform_1, window_bounds = array<i64: 128, 128>}, {transform_indices = @transform_2, window_bounds = array<i64: 128, 128>}, {pipeline_mode = #tpu.pipeline_mode<synchronous>, transform_indices = @transform_3, window_bounds = array<i64: 256, 128>}, {pipeline_mode = #tpu.pipeline_mode<synchronous>, transform_indices = @transform_4, window_bounds = array<i64: 1, 128>}, {transform_indices = @transform_5, window_bounds = array<i64: 128, 128>}]} {
    %c0_i32 = arith.constant 0 : i32
    %0 = arith.cmpi eq, %arg1, %c0_i32 : i32
    %1 = arith.extui %0 : i1 to i32
    %c0_i32_0 = arith.constant 0 : i32
    %2 = arith.cmpi ne, %1, %c0_i32_0 : i32
    scf.if %2 {
      %cst_10 = arith.constant 0.000000e+00 : f32
      %12 = vector.broadcast %cst_10 : f32 to vector<128x128xf32>
      %c0_11 = arith.constant 0 : index
      %c0_12 = arith.constant 0 : index
      %13 = vector.load %arg8[%c0_11, %c0_12] : memref<128x128xf32, #tpu.memory_space<vmem>>, vector<128x128xf32>
      tpu.vector_store %arg8[%c0_11, %c0_12], %12 {strides = array<i32>} : memref<128x128xf32, #tpu.memory_space<vmem>>, vector<128x128xf32>,
    } else {
    }
    %c0 = arith.constant 0 : index
    %c0_1 = arith.constant 0 : index
    %3 = vector.load %arg8[%c0, %c0_1] : memref<128x128xf32, #tpu.memory_space<vmem>>, vector<128x128xf32>
    %c0_2 = arith.constant 0 : index
    %c0_3 = arith.constant 0 : index
    %4 = vector.load %arg2[%c0_2, %c0_3] : memref<128x128xbf16, #tpu.memory_space<vmem>>, vector<128x128xbf16>
    %c0_4 = arith.constant 0 : index
    %c0_5 = arith.constant 0 : index
    %5 = vector.load %arg3[%c0_4, %c0_5] : memref<128x128xbf16, #tpu.memory_space<vmem>>, vector<128x128xbf16>
    %cst = arith.constant dense<0.000000e+00> : vector<128x128xf32>
    %6 = tpu.matmul %4, %5, %cst {dimension_numbers = #tpu.dot_dimension_numbers<[1], [0], [0], [1], [0, 0, 1, 1], [], []>} : vector<128x128xbf16>, vector<128x128xbf16>, vector<128x128xf32> -> vector<128x128xf32>
    %7 = arith.addf %3, %6 : vector<128x128xf32>
    %c0_6 = arith.constant 0 : index
    %c0_7 = arith.constant 0 : index
    %8 = vector.load %arg8[%c0_6, %c0_7] : memref<128x128xf32, #tpu.memory_space<vmem>>, vector<128x128xf32>
    tpu.vector_store %arg8[%c0_6, %c0_7], %7 {strides = array<i32>} : memref<128x128xf32, #tpu.memory_space<vmem>>, vector<128x128xf32>,
    %c0_i32_8 = arith.constant 0 : i32
    %9 = arith.cmpi eq, %arg1, %c0_i32_8 : i32
    %10 = arith.extui %9 : i1 to i32
    %c0_i32_9 = arith.constant 0 : i32
    %11 = arith.cmpi ne, %10, %c0_i32_9 : i32
    scf.if %11 {
      %c0_10 = arith.constant 0 : index
      %c0_11 = arith.constant 0 : index
      %12 = vector.load %arg8[%c0_10, %c0_11] : memref<128x128xf32, #tpu.memory_space<vmem>>, vector<128x128xf32>
      %13 = arith.truncf %12 : vector<128x128xf32> to vector<128x128xbf16>
      %c0_12 = arith.constant 0 : index
      %c0_13 = arith.constant 0 : index
      %14 = vector.load %arg4[%c0_12, %c0_13] : memref<128x128xbf16, #tpu.memory_space<vmem>>, vector<128x128xbf16>
      %15 = tpu.concatenate %13, %14 in 1 : vector<128x128xbf16>, vector<128x128xbf16> -> vector<128x256xbf16>
      %c0_14 = arith.constant 0 : index
      %c0_15 = arith.constant 0 : index
      %16 = vector.load %arg5[%c0_14, %c0_15] : memref<256x128xbf16, #tpu.memory_space<vmem>>, vector<256x128xbf16>
      %cst_16 = arith.constant dense<0.000000e+00> : vector<128x128xf32>
      %17 = tpu.matmul %15, %16, %cst_16 {dimension_numbers = #tpu.dot_dimension_numbers<[1], [0], [0], [1], [0, 0, 1, 1], [], []>} : vector<128x256xbf16>, vector<256x128xbf16>, vector<128x128xf32> -> vector<128x128xf32>
      %c0_17 = arith.constant 0 : index
      %c0_18 = arith.constant 0 : index
      %18 = vector.load %arg6[%c0_17, %c0_18] : memref<1x128xf32, #tpu.memory_space<vmem>>, vector<1x128xf32>
      %19 = vector.broadcast %18 : vector<1x128xf32> to vector<128x128xf32>
      %20 = arith.addf %17, %19 : vector<128x128xf32>
      %cst_19 = arith.constant 0.000000e+00 : f32
      %21 = vector.broadcast %cst_19 : f32 to vector<128x128xf32>
      %22 = arith.maximumf %20, %21 : vector<128x128xf32>
      %23 = arith.truncf %22 : vector<128x128xf32> to vector<128x128xbf16>
      %c0_20 = arith.constant 0 : index
      %c0_21 = arith.constant 0 : index
      %24 = vector.load %arg7[%c0_20, %c0_21] : memref<128x128xbf16, #tpu.memory_space<vmem>>, vector<128x128xbf16>
      tpu.vector_store %arg7[%c0_20, %c0_21], %23 {strides = array<i32>} : memref<128x128xbf16, #tpu.memory_space<vmem>>, vector<128x128xbf16>,
    } else {
    }
    return
  }
  func.func @transform_0(%arg0: i32, %arg1: i32) -> (i32, i32) {
    %c0_i32 = arith.constant 0 : i32
    return %arg0, %arg1 : i32, i32
  }
  func.func @transform_1(%arg0: i32, %arg1: i32) -> (i32, i32) {
    %c0_i32 = arith.constant 0 : i32
    %c0_i32_0 = arith.constant 0 : i32
    return %arg1, %c0_i32 : i32, i32
  }
  func.func @transform_2(%arg0: i32, %arg1: i32) -> (i32, i32) {
    %c0_i32 = arith.constant 0 : i32
    %c0_i32_0 = arith.constant 0 : i32
    return %arg0, %c0_i32 : i32, i32
  }
  func.func @transform_3(%arg0: i32, %arg1: i32) -> (i32, i32) {
    %c0_i32 = arith.constant 0 : i32
    %c0_i32_0 = arith.constant 0 : i32
    %c0_i32_1 = arith.constant 0 : i32
    return %c0_i32, %c0_i32_0 : i32, i32
  }
  func.func @transform_4(%arg0: i32, %arg1: i32) -> (i32, i32) {
    %c0_i32 = arith.constant 0 : i32
    %c0_i32_0 = arith.constant 0 : i32
    %c0_i32_1 = arith.constant 0 : i32
    return %c0_i32, %c0_i32_0 : i32, i32
  }
  func.func @transform_5(%arg0: i32, %arg1: i32) -> (i32, i32) {
    %c0_i32 = arith.constant 0 : i32
    %c0_i32_0 = arith.constant 0 : i32
    return %arg0, %c0_i32 : i32, i32
  }
}

module attributes {stable_mosaic.version = 11 : i64} {
  func.func @_edge_mlp_kernel(%arg0: i32, %arg1: memref<256x1xi32, #tpu.memory_space<vmem>>, %arg2: memref<256x1xi32, #tpu.memory_space<vmem>>, %arg3: memref<128x128xbf16, #tpu.memory_space<vmem>>, %arg4: memref<256x128xbf16, #tpu.memory_space<vmem>>, %arg5: memref<1x128xf32, #tpu.memory_space<vmem>>, %arg6: memref<128x128xbf16, #tpu.memory_space<vmem>>, %arg7: memref<1x128xf32, #tpu.memory_space<vmem>>, %arg8: memref<256x128xf32, #tpu.memory_space<vmem>>) attributes {dimension_semantics = [#tpu.dimension_semantics<parallel>], iteration_bounds = array<i64: 1>, scalar_prefetch = 0 : i64, scratch_operands = 0 : i64, tpu.core_type = #tpu.core_type<tc>, window_params = [{transform_indices = @transform_0, window_bounds = array<i64: 256, 1>}, {transform_indices = @transform_1, window_bounds = array<i64: 256, 1>}, {pipeline_mode = #tpu.pipeline_mode<synchronous>, transform_indices = @transform_2, window_bounds = array<i64: 128, 128>}, {pipeline_mode = #tpu.pipeline_mode<synchronous>, transform_indices = @transform_3, window_bounds = array<i64: 256, 128>}, {pipeline_mode = #tpu.pipeline_mode<synchronous>, transform_indices = @transform_4, window_bounds = array<i64: 1, 128>}, {pipeline_mode = #tpu.pipeline_mode<synchronous>, transform_indices = @transform_5, window_bounds = array<i64: 128, 128>}, {pipeline_mode = #tpu.pipeline_mode<synchronous>, transform_indices = @transform_6, window_bounds = array<i64: 1, 128>}, {transform_indices = @transform_7, window_bounds = array<i64: 256, 128>}]} {
    %0 = tpu.iota {dimensions = array<i32: 1>} : vector<256x128xi32>
    %c0 = arith.constant 0 : index
    %c0_0 = arith.constant 0 : index
    %1 = vector.load %arg1[%c0, %c0_0] : memref<256x1xi32, #tpu.memory_space<vmem>>, vector<256x1xi32>
    %2 = vector.broadcast %1 : vector<256x1xi32> to vector<256x128xi32>
    %3 = arith.cmpi eq, %2, %0 : vector<256x128xi32>
    %cst = arith.constant 1.000000e+00 : f32
    %cst_1 = arith.constant 0.000000e+00 : f32
    %4 = vector.broadcast %cst : f32 to vector<256x128xf32>
    %5 = vector.broadcast %cst_1 : f32 to vector<256x128xf32>
    %6 = arith.select %3, %4, %5 : vector<256x128xi1>, vector<256x128xf32>
    %7 = arith.truncf %6 : vector<256x128xf32> to vector<256x128xbf16>
    %c0_2 = arith.constant 0 : index
    %c0_3 = arith.constant 0 : index
    %8 = vector.load %arg2[%c0_2, %c0_3] : memref<256x1xi32, #tpu.memory_space<vmem>>, vector<256x1xi32>
    %9 = vector.broadcast %8 : vector<256x1xi32> to vector<256x128xi32>
    %10 = arith.cmpi eq, %9, %0 : vector<256x128xi32>
    %cst_4 = arith.constant 1.000000e+00 : f32
    %cst_5 = arith.constant 0.000000e+00 : f32
    %11 = vector.broadcast %cst_4 : f32 to vector<256x128xf32>
    %12 = vector.broadcast %cst_5 : f32 to vector<256x128xf32>
    %13 = arith.select %10, %11, %12 : vector<256x128xi1>, vector<256x128xf32>
    %14 = arith.truncf %13 : vector<256x128xf32> to vector<256x128xbf16>
    %c0_6 = arith.constant 0 : index
    %c0_7 = arith.constant 0 : index
    %15 = vector.load %arg3[%c0_6, %c0_7] : memref<128x128xbf16, #tpu.memory_space<vmem>>, vector<128x128xbf16>
    %cst_8 = arith.constant dense<0.000000e+00> : vector<256x128xf32>
    %16 = tpu.matmul %7, %15, %cst_8 {dimension_numbers = #tpu.dot_dimension_numbers<[1], [0], [0], [1], [0, 0, 1, 1], [], []>} : vector<256x128xbf16>, vector<128x128xbf16>, vector<256x128xf32> -> vector<256x128xf32>
    %17 = arith.truncf %16 : vector<256x128xf32> to vector<256x128xbf16>
    %cst_9 = arith.constant dense<0.000000e+00> : vector<256x128xf32>
    %18 = tpu.matmul %14, %15, %cst_9 {dimension_numbers = #tpu.dot_dimension_numbers<[1], [0], [0], [1], [0, 0, 1, 1], [], []>} : vector<256x128xbf16>, vector<128x128xbf16>, vector<256x128xf32> -> vector<256x128xf32>
    %19 = arith.truncf %18 : vector<256x128xf32> to vector<256x128xbf16>
    %20 = tpu.concatenate %17, %19 in 1 : vector<256x128xbf16>, vector<256x128xbf16> -> vector<256x256xbf16>
    %c0_10 = arith.constant 0 : index
    %c0_11 = arith.constant 0 : index
    %21 = vector.load %arg4[%c0_10, %c0_11] : memref<256x128xbf16, #tpu.memory_space<vmem>>, vector<256x128xbf16>
    %cst_12 = arith.constant dense<0.000000e+00> : vector<256x128xf32>
    %22 = tpu.matmul %20, %21, %cst_12 {dimension_numbers = #tpu.dot_dimension_numbers<[1], [0], [0], [1], [0, 0, 1, 1], [], []>} : vector<256x256xbf16>, vector<256x128xbf16>, vector<256x128xf32> -> vector<256x128xf32>
    %c0_13 = arith.constant 0 : index
    %c0_14 = arith.constant 0 : index
    %23 = vector.load %arg5[%c0_13, %c0_14] : memref<1x128xf32, #tpu.memory_space<vmem>>, vector<1x128xf32>
    %24 = vector.broadcast %23 : vector<1x128xf32> to vector<256x128xf32>
    %25 = arith.addf %22, %24 : vector<256x128xf32>
    %cst_15 = arith.constant 0.000000e+00 : f32
    %26 = vector.broadcast %cst_15 : f32 to vector<256x128xf32>
    %27 = arith.maximumf %25, %26 : vector<256x128xf32>
    %28 = arith.truncf %27 : vector<256x128xf32> to vector<256x128xbf16>
    %c0_16 = arith.constant 0 : index
    %c0_17 = arith.constant 0 : index
    %29 = vector.load %arg6[%c0_16, %c0_17] : memref<128x128xbf16, #tpu.memory_space<vmem>>, vector<128x128xbf16>
    %cst_18 = arith.constant dense<0.000000e+00> : vector<256x128xf32>
    %30 = tpu.matmul %28, %29, %cst_18 {dimension_numbers = #tpu.dot_dimension_numbers<[1], [0], [0], [1], [0, 0, 1, 1], [], []>} : vector<256x128xbf16>, vector<128x128xbf16>, vector<256x128xf32> -> vector<256x128xf32>
    %c0_19 = arith.constant 0 : index
    %c0_20 = arith.constant 0 : index
    %31 = vector.load %arg7[%c0_19, %c0_20] : memref<1x128xf32, #tpu.memory_space<vmem>>, vector<1x128xf32>
    %32 = vector.broadcast %31 : vector<1x128xf32> to vector<256x128xf32>
    %33 = arith.addf %30, %32 : vector<256x128xf32>
    %c0_21 = arith.constant 0 : index
    %c0_22 = arith.constant 0 : index
    %34 = vector.load %arg8[%c0_21, %c0_22] : memref<256x128xf32, #tpu.memory_space<vmem>>, vector<256x128xf32>
    tpu.vector_store %arg8[%c0_21, %c0_22], %33 {strides = array<i32>} : memref<256x128xf32, #tpu.memory_space<vmem>>, vector<256x128xf32>,
    return
  }
  func.func @transform_0(%arg0: i32) -> (i32, i32) {
    %c0_i32 = arith.constant 0 : i32
    %c0_i32_0 = arith.constant 0 : i32
    return %arg0, %c0_i32 : i32, i32
  }
  func.func @transform_1(%arg0: i32) -> (i32, i32) {
    %c0_i32 = arith.constant 0 : i32
    %c0_i32_0 = arith.constant 0 : i32
    return %arg0, %c0_i32 : i32, i32
  }
  func.func @transform_2(%arg0: i32) -> (i32, i32) {
    %c0_i32 = arith.constant 0 : i32
    %c0_i32_0 = arith.constant 0 : i32
    %c0_i32_1 = arith.constant 0 : i32
    return %c0_i32, %c0_i32_0 : i32, i32
  }
  func.func @transform_3(%arg0: i32) -> (i32, i32) {
    %c0_i32 = arith.constant 0 : i32
    %c0_i32_0 = arith.constant 0 : i32
    %c0_i32_1 = arith.constant 0 : i32
    return %c0_i32, %c0_i32_0 : i32, i32
  }
  func.func @transform_4(%arg0: i32) -> (i32, i32) {
    %c0_i32 = arith.constant 0 : i32
    %c0_i32_0 = arith.constant 0 : i32
    %c0_i32_1 = arith.constant 0 : i32
    return %c0_i32, %c0_i32_0 : i32, i32
  }
  func.func @transform_5(%arg0: i32) -> (i32, i32) {
    %c0_i32 = arith.constant 0 : i32
    %c0_i32_0 = arith.constant 0 : i32
    %c0_i32_1 = arith.constant 0 : i32
    return %c0_i32, %c0_i32_0 : i32, i32
  }
  func.func @transform_6(%arg0: i32) -> (i32, i32) {
    %c0_i32 = arith.constant 0 : i32
    %c0_i32_0 = arith.constant 0 : i32
    %c0_i32_1 = arith.constant 0 : i32
    return %c0_i32, %c0_i32_0 : i32, i32
  }
  func.func @transform_7(%arg0: i32) -> (i32, i32) {
    %c0_i32 = arith.constant 0 : i32
    %c0_i32_0 = arith.constant 0 : i32
    return %arg0, %c0_i32 : i32, i32
  }
}

</mosaic_0001>

<bundles_post_ra>
// kernel: edge_classifier_gnn.3
= control target key start
LH: loop header
LB: loop body
LE: loop exit
PB: predicated region body
PF: predicated region fallthrough
CT: control target
= control target key end

     0   :  { %s1220_s1 = inlined_call_operand.vmem [shape: bf16[128,128], index: 1, kind: input, shape index: {}, may-alias: {1,2}]   ;;  %s1221_s0 = inlined_call_operand.vmem [shape: bf16[128,128], index: 0, kind: input, shape index: {}]   ;;  %s1222_s3 = inlined_call_operand.vmem [shape: bf16[256,128], index: 3, kind: input, shape index: {}]   ;;  %s1223_s2 = inlined_call_operand.vmem [shape: bf16[128,128], index: 2, kind: input, shape index: {}, may-alias: {1,2}]   ;;  %s1224_s4 = inlined_call_operand.vmem [shape: f32[1,128], index: 4, kind: input, shape index: {}]   ;;  %s1225_s5 = inlined_call_operand.vmem [shape: bf16[128,128], index: 5, kind: output, shape index: {}]  }
   0x1   :  { %v985_v0 = vld [vmem:[%s1220_s1] sm:$0xff]   ;;  %v986_v1 = vld [vmem:[%s1220_s1 + $0x8] sm:$0xff]   ;;  %v987_v2 = vld [vmem:[%s1220_s1 + $0x10] sm:$0xff]  }
   0x2   :  { %937 = vmatprep.subr.bf16.mxu0 %v985_v0  ;;  %v988_v3 = vld [vmem:[%s1220_s1 + $0x18] sm:$0xff]   ;;  %v993_v4 = vld [vmem:[%s1221_s0] sm:$0xff]   ;;  %v990_v6 = vld [vmem:[%s1220_s1 + $0x28] sm:$0xff]  }
   0x3   :  { %938 = vmatpush3.bf16.msra.mxu0 %v985_v0  ;;  %953 = vmatprep.mubr.bf16.mxu0 %v993_v4  ;;  %v989_v5 = vld [vmem:[%s1220_s1 + $0x20] sm:$0xff]   ;;  %v1003_v9 = vld [vmem:[%s1222_s3 + $0x48] sm:$0xff]   ;;  %v991_v10 = vld [vmem:[%s1220_s1 + $0x30] sm:$0xff]  }
   0x4   :  { %939 = vmatprep.subr.bf16.mxu0 %v986_v1  ;;  %v1001_v7 = vld [vmem:[%s1222_s3 + $0x40] sm:$0xff]   ;;  %v1004_v11 = vld [vmem:[%s1222_s3 + $0x8] sm:$0xff]   ;;  %v1005_v12 = vld [vmem:[%s1222_s3 + $0x50] sm:$0xff]  }
   0x5   :  { %v1002_v8 = vld [vmem:[%s1222_s3] sm:$0xff]   ;;  %969 = vmatprep.subr.bf16.mxu1 %v1001_v7  ;;  %v992_v13 = vld [vmem:[%s1220_s1 + $0x38] sm:$0xff]   ;;  %v1006_v14 = vld [vmem:[%s1222_s3 + $0x10] sm:$0xff]  }
   0x6   :  { %977 = vmatpush3.bf16.msra.mxu1 %v1002_v8  ;;  %v1007_v15 = vld [vmem:[%s1222_s3 + $0x58] sm:$0xff]   ;;  %v994_v16 = vld [vmem:[%s1221_s0 + $0x8] sm:$0xff]   ;;  %v1009_v18 = vld [vmem:[%s1222_s3 + $0x60] sm:$0xff]  }
   0x7   :  { %940 = vmatpush3.bf16.msra.mxu0 %v986_v1  ;;  %970 = vmatprep.subr.bf16.mxu1 %v1003_v9  ;;  %v1008_v17 = vld [vmem:[%s1222_s3 + $0x18] sm:$0xff]   ;;  %v995_v19 = vld [vmem:[%s1221_s0 + $0x10] sm:$0xff]   ;;  %v1010_v20 = vld [vmem:[%s1222_s3 + $0x20] sm:$0xff]  }
   0x8   :  { %941 = vmatprep.subr.bf16.mxu0 %v987_v2  ;;  %v1011_v21 = vld [vmem:[%s1222_s3 + $0x68] sm:$0xff]   ;;  %v996_v22 = vld [vmem:[%s1221_s0 + $0x18] sm:$0xff]   ;;  %v997_v24 = vld [vmem:[%s1221_s0 + $0x20] sm:$0xff]  }
   0x9   :  { %v1012_v23 = vld [vmem:[%s1222_s3 + $0x28] sm:$0xff]   ;;  %v1013_v25 = vld [vmem:[%s1222_s3 + $0x70] sm:$0xff]   ;;  %v1000_v29 = vld [vmem:[%s1221_s0 + $0x38] sm:$0xff]  }
   0xa   :  { %978 = vmatpush3.bf16.msra.mxu1 %v1004_v11  ;;  %v1014_v26 = vld [vmem:[%s1222_s3 + $0x30] sm:$0xff]   ;;  %v998_v27 = vld [vmem:[%s1221_s0 + $0x28] sm:$0xff]   ;;  %v1015_v30 = vld [vmem:[%s1222_s3 + $0x78] sm:$0xff]  }
   0xb   :  { %942 = vmatpush3.bf16.msra.mxu0 %v987_v2  ;;  %971 = vmatprep.subr.bf16.mxu1 %v1005_v12  ;;  %v999_v28 = vld [vmem:[%s1221_s0 + $0x30] sm:$0xff]   ;;  %v1016_v31 = vld [vmem:[%s1222_s3 + $0x38] sm:$0xff]   ;;  %v1017_v32 = vld [vmem:[%s1223_s2] sm:$0xff]  }
   0xc   :  { %943 = vmatprep.subr.bf16.mxu0 %v988_v3  ;;  %v1019_v33 = vld [vmem:[%s1223_s2 + $0x10] sm:$0xff]   ;;  %v1018_v39 = vld [vmem:[%s1223_s2 + $0x8] sm:$0xff]   ;;  %v1020_v46 = vld [vmem:[%s1223_s2 + $0x18] sm:$0xff]  }
   0xd   :  { %588 = vmatprep.mubr.bf16.mxu1 %v1019_v33  ;;  %v1021_v53 = vld [vmem:[%s1223_s2 + $0x20] sm:$0xff]   ;;  %v1022_v58 = vld [vmem:[%s1223_s2 + $0x28] sm:$0xff]   ;;  %v1023_v62 = vld [vmem:[%s1223_s2 + $0x30] sm:$0xff]  }
   0xe   :  { %979 = vmatpush3.bf16.msra.mxu1 %v1006_v14  ;;  %v1024_v63 = vld [vmem:[%s1223_s2 + $0x38] sm:$0xff]   ;;  %v1178_v1 = vld [vmem:[%s1224_s4] ss:$0 sm:$0xff] }
   0xf   :  { %944 = vmatpush3.bf16.msra.mxu0 %v988_v3  ;;  %972 = vmatprep.subr.bf16.mxu1 %v1007_v15 }
  0x10   :  { %945 = vmatprep.subr.bf16.mxu0 %v989_v5 }
  0x12   :  { %980 = vmatpush3.bf16.msra.mxu1 %v1008_v17 }
  0x13   :  { %946 = vmatpush3.bf16.msra.mxu0 %v989_v5  ;;  %973 = vmatprep.subr.bf16.mxu1 %v1009_v18 }
  0x14   :  { %947 = vmatprep.subr.bf16.mxu0 %v990_v6 }
  0x16   :  { %981 = vmatpush3.bf16.msra.mxu1 %v1010_v20 }
  0x17   :  { %948 = vmatpush3.bf16.msra.mxu0 %v990_v6  ;;  %974 = vmatprep.subr.bf16.mxu1 %v1011_v21 }
  0x18   :  { %949 = vmatprep.subr.bf16.mxu0 %v991_v10 }
  0x1a   :  { %982 = vmatpush3.bf16.msra.mxu1 %v1012_v23 }
  0x1b   :  { %950 = vmatpush3.bf16.msra.mxu0 %v991_v10  ;;  %975 = vmatprep.subr.bf16.mxu1 %v1013_v25 }
  0x1c   :  { %951 = vmatprep.subr.bf16.mxu0 %v992_v13 }
  0x1e   :  { %983 = vmatpush3.bf16.msra.mxu1 %v1014_v26 }
  0x1f   :  { %952 = vmatpush3.bf16.msra.mxu0 %v992_v13  ;;  %976 = vmatprep.subr.bf16.mxu1 %v1015_v30 }
  0x20   :  { %873 = vmatprep.subr.bf16.mxu0 %v1001_v7 }
  0x22   :  { %954 = vmatmul.mubr.bf16.vlgmr.msra.gmra.mrb[0].mxu0 %v994_v16  ;;  %984 = vmatpush3.bf16.msra.mxu1 %v1016_v31 }
  0x23   :  { %957 = vmatprep.mubr.bf16.mxu0 %v995_v19  ;;  %874 = vmatpush3.bf16.msra.mxu0 %v1002_v8 }
  0x24   :  { %875 = vmatprep.subr.bf16.mxu0 %v1003_v9 }
  0x27   :  { %876 = vmatpush3.bf16.msra.mxu0 %v1004_v11 }
  0x28   :  { %877 = vmatprep.subr.bf16.mxu0 %v1005_v12 }
  0x2a   :  { %958 = vmatmul.mubr.bf16.gmra.mrb[4].mxu0 %v996_v22 }
  0x2b   :  { %961 = vmatprep.mubr.bf16.mxu0 %v997_v24  ;;  %878 = vmatpush3.bf16.msra.mxu0 %v1006_v14 }
  0x2c   :  { %879 = vmatprep.subr.bf16.mxu0 %v1007_v15 }
  0x2f   :  { %880 = vmatpush3.bf16.msra.mxu0 %v1008_v17 }
  0x30   :  { %881 = vmatprep.subr.bf16.mxu0 %v1009_v18 }
  0x32   :  { %962 = vmatmul.mubr.bf16.gmra.mrb[8].mxu0 %v998_v27 }
  0x33   :  { %965 = vmatprep.mubr.bf16.mxu0 %v999_v28  ;;  %882 = vmatpush3.bf16.msra.mxu0 %v1010_v20 }
  0x34   :  { %883 = vmatprep.subr.bf16.mxu0 %v1011_v21 }
  0x37   :  { %884 = vmatpush3.bf16.msra.mxu0 %v1012_v23 }
  0x38   :  { %885 = vmatprep.subr.bf16.mxu0 %v1013_v25 }
  0x3a   :  { %966 = vmatmul.mubr.bf16.gmra.mrb[12].mxu0 %v1000_v29 }
  0x3b   :  { %886 = vmatpush3.bf16.msra.mxu0 %v1014_v26  ;;  %572 = vmatprep.mubr.bf16.mxu0 %v1017_v32 }
  0x3c   :  { %887 = vmatprep.subr.bf16.mxu0 %v1015_v30 }
  0x3f   :  { %888 = vmatpush3.bf16.msra.mxu0 %v1016_v31 }
  0xf5   :  { %v955_v34 = vpop.f32.mrb[0].mxu0 }
  0xf6   :  { %v219_v35 = vpop.f32.mrb[1].mxu0 }
  0xf7   :  { %v956_v36 = vpop.f32.mrb[2].mxu0 }
  0xf8   :  { %v334_v37 = vpack.c.bf16 %v956_v36, %v955_v34  ;;  %v222_v38 = vpop.f32.mrb[3].mxu0 }
  0xf9   :  { %v333_v40 = vpack.c.bf16 %v222_v38, %v219_v35 }
  0xfb   :  { %573 = vmatmul.mubr.bf16.vlgmr.msra.gmra.mrb[16].mxu0 %v333_v40 }
  0xfc   :  { %580 = vmatprep.mubr.bf16.mxu0 %v1018_v39 }
  0xfd   :  { %v959_v41 = vpop.f32.mrb[4].mxu0 }
  0xfe   :  { %v235_v42 = vpop.f32.mrb[5].mxu0 }
  0xff   :  { %v960_v43 = vpop.f32.mrb[6].mxu0 }
 0x100   :  { %v336_v44 = vpack.c.bf16 %v960_v43, %v959_v41  ;;  %v238_v45 = vpop.f32.mrb[7].mxu0 }
 0x101   :  { %v335_v47 = vpack.c.bf16 %v238_v45, %v235_v42 }
 0x103   :  { %581 = vmatmul.mubr.bf16.gmra.mrb[20].mxu0 %v334_v37  ;;  %589 = vmatmul.mubr.bf16.vlgmr.msra.gmra.mrb[0].mxu1 %v335_v47 }
 0x104   :  { %596 = vmatprep.mubr.bf16.mxu1 %v1020_v46 }
 0x105   :  { %v963_v48 = vpop.f32.mrb[8].mxu0 }
 0x106   :  { %v251_v49 = vpop.f32.mrb[9].mxu0 }
 0x107   :  { %v964_v50 = vpop.f32.mrb[10].mxu0 }
 0x108   :  { %v338_v51 = vpack.c.bf16 %v964_v50, %v963_v48  ;;  %v254_v52 = vpop.f32.mrb[11].mxu0 }
 0x109   :  { %v337_v54 = vpack.c.bf16 %v254_v52, %v251_v49 }
 0x10b   :  { %597 = vmatmul.mubr.bf16.gmra.mrb[4].mxu1 %v336_v44 }
 0x10c   :  { %604 = vmatprep.mubr.bf16.mxu1 %v1021_v53 }
 0x10d   :  { %v967_v55 = vpop.f32.mrb[12].mxu0 }
 0x10e   :  { %v267_v56 = vpop.f32.mrb[13].mxu0 }
 0x10f   :  { %v968_v57 = vpop.f32.mrb[14].mxu0 }
 0x110   :  { %v340_v59 = vpack.c.bf16 %v968_v57, %v967_v55  ;;  %v270_v60 = vpop.f32.mrb[15].mxu0 }
 0x111   :  { %v339_v61 = vpack.c.bf16 %v270_v60, %v267_v56 }
 0x113   :  { %605 = vmatmul.mubr.bf16.gmra.mrb[8].mxu1 %v337_v54 }
 0x114   :  { %612 = vmatprep.mubr.bf16.mxu1 %v1022_v58 }
 0x11b   :  { %613 = vmatmul.mubr.bf16.gmra.mrb[12].mxu1 %v338_v51 }
 0x11c   :  { %620 = vmatprep.mubr.bf16.mxu1 %v1023_v62 }
 0x123   :  { %621 = vmatmul.mubr.bf16.gmra.mrb[16].mxu1 %v339_v61 }
 0x124   :  { %628 = vmatprep.mubr.bf16.mxu1 %v1024_v63 }
 0x12b   :  { %629 = vmatmul.mubr.bf16.gmra.mrb[20].mxu1 %v340_v59 }
 0x1ce   :  { %v889_v0 = vpop.f32.mrb[16].mxu0 }
 0x1cf   :  { %v890_v2 = vpop.f32.mrb[17].mxu0 }
 0x1d0   :  { %v891_v3 = vadd.f32 %v890_v2, %v889_v0  ;;  %v892_v4 = vpop.f32.mrb[18].mxu0 }
 0x1d1   :  { %v893_v5 = vpop.f32.mrb[19].mxu0 }
 0x1d2   :  { %v575_v6 = vadd.f32 %v891_v3, %v1178_v1  ;;  %v894_v7 = vadd.f32 %v893_v5, %v892_v4 }
 0x1d4   :  { %v578_v8 = vadd.f32 %v894_v7, %v1178_v1  ;;  %v637_v9 = vmax.f32 %v575_v6, 0.0 }
 0x1d6   :  { %v638_v10 = vmax.f32 %v578_v8, 0.0  ;;  %v895_v11 = vpop.f32.mrb[20].mxu0  ;;  %v901_v12 = vpop.f32.mrb[0].mxu1 }
 0x1d7   :  { %v896_v13 = vpop.f32.mrb[21].mxu0  ;;  %v902_v14 = vpop.f32.mrb[1].mxu1 }
 0x1d8   :  { %v813_v15 = vpack.c.bf16 %v638_v10, %v637_v9  ;;  %v897_v16 = vadd.f32 %v896_v13, %v895_v11  ;;  %v903_v17 = vadd.f32 %v902_v14, %v901_v12  ;;  %v898_v18 = vpop.f32.mrb[22].mxu0  ;;  %v904_v19 = vpop.f32.mrb[2].mxu1 }
 0x1d9   :  { %v899_v20 = vpop.f32.mrb[23].mxu0  ;;  %v905_v21 = vpop.f32.mrb[3].mxu1 }
 0x1da   :  { %814 = vst [vmem:[%s1225_s5] sm:$0xff] %v813_v15   ;;  %v583_v22 = vadd.f32 %v897_v16, %v1178_v1  ;;  %v591_v23 = vadd.f32 %v903_v17, %v1178_v1  ;;  %v900_v24 = vadd.f32 %v899_v20, %v898_v18  ;;  %v906_v25 = vadd.f32 %v905_v21, %v904_v19 }
 0x1dc   :  { %v586_v26 = vadd.f32 %v900_v24, %v1178_v1  ;;  %v594_v27 = vadd.f32 %v906_v25, %v1178_v1  ;;  %v639_v28 = vmax.f32 %v583_v22, 0.0  ;;  %v641_v29 = vmax.f32 %v591_v23, 0.0 }
 0x1de   :  { %v640_v30 = vmax.f32 %v586_v26, 0.0  ;;  %v642_v31 = vmax.f32 %v594_v27, 0.0  ;;  %v907_v32 = vpop.f32.mrb[4].mxu1 }
 0x1df   :  { %v908_v33 = vpop.f32.mrb[5].mxu1 }
 0x1e0   :  { %v818_v34 = vpack.c.bf16 %v640_v30, %v639_v28  ;;  %v823_v35 = vpack.c.bf16 %v642_v31, %v641_v29  ;;  %v909_v36 = vadd.f32 %v908_v33, %v907_v32  ;;  %v910_v37 = vpop.f32.mrb[6].mxu1 }
 0x1e1   :  { %v911_v38 = vpop.f32.mrb[7].mxu1 }
 0x1e2   :  { %850 = vst [vmem:[%s1225_s5 + $0x8] sm:$0xff] %v818_v34   ;;  %851 = vst [vmem:[%s1225_s5 + $0x10] sm:$0xff] %v823_v35   ;;  %v599_v39 = vadd.f32 %v909_v36, %v1178_v1  ;;  %v912_v40 = vadd.f32 %v911_v38, %v910_v37 }
 0x1e4   :  { %v602_v41 = vadd.f32 %v912_v40, %v1178_v1  ;;  %v643_v42 = vmax.f32 %v599_v39, 0.0 }
 0x1e6   :  { %v644_v43 = vmax.f32 %v602_v41, 0.0  ;;  %v913_v44 = vpop.f32.mrb[8].mxu1 }
 0x1e7   :  { %v914_v45 = vpop.f32.mrb[9].mxu1 }
 0x1e8   :  { %v828_v46 = vpack.c.bf16 %v644_v43, %v643_v42  ;;  %v915_v47 = vadd.f32 %v914_v45, %v913_v44  ;;  %v916_v48 = vpop.f32.mrb[10].mxu1 }
 0x1e9   :  { %v917_v49 = vpop.f32.mrb[11].mxu1 }
 0x1ea   :  { %852 = vst [vmem:[%s1225_s5 + $0x18] sm:$0xff] %v828_v46   ;;  %v607_v50 = vadd.f32 %v915_v47, %v1178_v1  ;;  %v918_v51 = vadd.f32 %v917_v49, %v916_v48 }
 0x1ec   :  { %v610_v52 = vadd.f32 %v918_v51, %v1178_v1  ;;  %v645_v53 = vmax.f32 %v607_v50, 0.0 }
 0x1ee   :  { %v646_v54 = vmax.f32 %v610_v52, 0.0  ;;  %v919_v55 = vpop.f32.mrb[12].mxu1 }
 0x1ef   :  { %v920_v56 = vpop.f32.mrb[13].mxu1 }
 0x1f0   :  { %v833_v57 = vpack.c.bf16 %v646_v54, %v645_v53  ;;  %v921_v58 = vadd.f32 %v920_v56, %v919_v55  ;;  %v922_v59 = vpop.f32.mrb[14].mxu1 }
 0x1f1   :  { %v923_v60 = vpop.f32.mrb[15].mxu1 }
 0x1f2   :  { %853 = vst [vmem:[%s1225_s5 + $0x20] sm:$0xff] %v833_v57   ;;  %v615_v61 = vadd.f32 %v921_v58, %v1178_v1  ;;  %v924_v62 = vadd.f32 %v923_v60, %v922_v59 }
 0x1f4   :  { %v618_v63 = vadd.f32 %v924_v62, %v1178_v1  ;;  %v647_v0 = vmax.f32 %v615_v61, 0.0 }
 0x1f6   :  { %v648_v2 = vmax.f32 %v618_v63, 0.0  ;;  %v925_v3 = vpop.f32.mrb[16].mxu1 }
 0x1f7   :  { %v926_v4 = vpop.f32.mrb[17].mxu1 }
 0x1f8   :  { %v838_v5 = vpack.c.bf16 %v648_v2, %v647_v0  ;;  %v927_v6 = vadd.f32 %v926_v4, %v925_v3  ;;  %v928_v7 = vpop.f32.mrb[18].mxu1 }
 0x1f9   :  { %v929_v8 = vpop.f32.mrb[19].mxu1 }
 0x1fa   :  { %854 = vst [vmem:[%s1225_s5 + $0x28] sm:$0xff] %v838_v5   ;;  %v623_v9 = vadd.f32 %v927_v6, %v1178_v1  ;;  %v930_v10 = vadd.f32 %v929_v8, %v928_v7 }
 0x1fc   :  { %v626_v11 = vadd.f32 %v930_v10, %v1178_v1  ;;  %v649_v12 = vmax.f32 %v623_v9, 0.0 }
 0x1fe   :  { %v650_v13 = vmax.f32 %v626_v11, 0.0  ;;  %v931_v14 = vpop.f32.mrb[20].mxu1 }
 0x1ff   :  { %v932_v15 = vpop.f32.mrb[21].mxu1 }
 0x200   :  { %v843_v16 = vpack.c.bf16 %v650_v13, %v649_v12  ;;  %v933_v17 = vadd.f32 %v932_v15, %v931_v14  ;;  %v934_v18 = vpop.f32.mrb[22].mxu1 }
 0x201   :  { %v935_v19 = vpop.f32.mrb[23].mxu1 }
 0x202   :  { %855 = vst [vmem:[%s1225_s5 + $0x30] sm:$0xff] %v843_v16   ;;  %v631_v20 = vadd.f32 %v933_v17, %v1178_v1  ;;  %v936_v21 = vadd.f32 %v935_v19, %v934_v18 }
 0x204   :  { %v634_v22 = vadd.f32 %v936_v21, %v1178_v1  ;;  %v651_v23 = vmax.f32 %v631_v20, 0.0 }
 0x206   :  { %v652_v24 = vmax.f32 %v634_v22, 0.0 }
 0x208   :  { %v848_v25 = vpack.c.bf16 %v652_v24, %v651_v23 }
 0x20a   :  { %856 = vst [vmem:[%s1225_s5 + $0x38] sm:$0xff] %v848_v25  }

// kernel: edge_classifier_gnn.5
= control target key start
LH: loop header
LB: loop body
LE: loop exit
PB: predicated region body
PF: predicated region fallthrough
CT: control target
= control target key end

     0   :  { %v1953_v0 = vmov 0   ;;  %s2687_s0 = inlined_call_operand.vmem [shape: s32[256,1], index: 0, kind: input, shape index: {}]   ;;  %s2688_s2 = inlined_call_operand.vmem [shape: bf16[128,128], index: 2, kind: input, shape index: {}]   ;;  %s2689_s1 = inlined_call_operand.vmem [shape: s32[256,1], index: 1, kind: input, shape index: {}]   ;;  %s2690_s3 = inlined_call_operand.vmem [shape: bf16[256,128], index: 3, kind: input, shape index: {}]   ;;  %s2691_s5 = inlined_call_operand.vmem [shape: bf16[128,128], index: 5, kind: input, shape index: {}]   ;;  %s2692_s4 = inlined_call_operand.vmem [shape: f32[1,128], index: 4, kind: input, shape index: {}]   ;;  %s2693_s6 = inlined_call_operand.vmem [shape: f32[1,128], index: 6, kind: input, shape index: {}]   ;;  %s2694_s7 = inlined_call_operand.vmem [shape: f32[256,128], index: 7, kind: output, shape index: {}]  }
   0x1   :  { %1920 = vset.pattern.permute.xlu1 %v1953_v0  ;;  %1919 = vset.pattern.permute.xlu0 %v1953_v0  ;;  %v47_v1 = vld [vmem:[%s2687_s0 + $0x90] sm:$0xff]  ;;  %v45_v2 = vld [vmem:[%s2687_s0 + $0x80] sm:$0xff]  ;;  %v48_v3 = vld [vmem:[%s2687_s0 + $0x98] sm:$0xff] }
   0x2   :  { %116 = vperm.xlu1 %1920, %v47_v1   ;;  %110 = vperm.xlu0 %1919, %v45_v2   ;;  %v46_v4 = vld [vmem:[%s2687_s0 + $0x88] sm:$0xff]  ;;  %v49_v6 = vld [vmem:[%s2687_s0 + $0xa0] sm:$0xff]  ;;  %v52_v7 = vld [vmem:[%s2687_s0 + $0xb8] sm:$0xff] }
   0x3   :  { %v50_v5 = vld [vmem:[%s2687_s0 + $0xa8] sm:$0xff]  ;;  %v51_v8 = vld [vmem:[%s2687_s0 + $0xb0] sm:$0xff]  ;;  %v53_v10 = vld [vmem:[%s2687_s0 + $0xc0] sm:$0xff] }
   0x4   :  { %v54_v9 = vld [vmem:[%s2687_s0 + $0xc8] sm:$0xff]  ;;  %v56_v11 = vld [vmem:[%s2687_s0 + $0xd8] sm:$0xff]  ;;  %v55_v12 = vld [vmem:[%s2687_s0 + $0xd0] sm:$0xff] }
   0x5   :  { %v2034_v13 = vld [vmem:[%s2688_s2] sm:$0xff]   ;;  %v2039_v14 = vld [vmem:[%s2688_s2 + $0x8] sm:$0xff]   ;;  %v2055_v17 = vld [vmem:[%s2688_s2 + $0x10] sm:$0xff]  }
   0x6   :  { %119 = vperm.xlu1 %1920, %v48_v3   ;;  %113 = vperm.xlu0 %1919, %v46_v4   ;;  %v58_v15 = vld [vmem:[%s2687_s0 + $0xe8] sm:$0xff]  ;;  %v57_v16 = vld [vmem:[%s2687_s0 + $0xe0] sm:$0xff]  ;;  %v60_v18 = vld [vmem:[%s2687_s0 + $0xf8] sm:$0xff] }
   0x7   :  { %1901 = vmatprep.subr.bf16.mxu1 %v2034_v13  ;;  %1757 = vmatprep.subr.bf16.mxu0 %v2034_v13  ;;  %v59_v19 = vld [vmem:[%s2687_s0 + $0xf0] sm:$0xff]  ;;  %v2070_v20 = vld [vmem:[%s2688_s2 + $0x18] sm:$0xff]   ;;  %v238_v21 = vld [vmem:[%s2689_s1 + $0x8] sm:$0xff] }
   0x8   :  { %1909 = vmatpush3.bf16.msra.mxu1 %v2034_v13  ;;  %1758 = vmatpush3.bf16.msra.mxu0 %v2034_v13  ;;  %v237_v22 = vld [vmem:[%s2689_s1] sm:$0xff]  ;;  %v30_v24 = vld [vmem:[%s2687_s0 + $0x8] sm:$0xff]  ;;  %v240_v27 = vld [vmem:[%s2689_s1 + $0x18] sm:$0xff] }
   0x9   :  { %1902 = vmatprep.subr.bf16.mxu1 %v2039_v14  ;;  %1759 = vmatprep.subr.bf16.mxu0 %v2039_v14  ;;  %v2085_v23 = vld [vmem:[%s2688_s2 + $0x20] sm:$0xff]   ;;  %v2100_v26 = vld [vmem:[%s2688_s2 + $0x28] sm:$0xff]   ;;  %v239_v28 = vld [vmem:[%s2689_s1 + $0x10] sm:$0xff] }
   0xa   :  { %125 = vperm.xlu1 %1920, %v50_v5   ;;  %122 = vperm.xlu0 %1919, %v49_v6   ;;  %v29_v25 = vld [vmem:[%s2687_s0] sm:$0xff]  ;;  %v2115_v29 = vld [vmem:[%s2688_s2 + $0x30] sm:$0xff]   ;;  %v32_v30 = vld [vmem:[%s2687_s0 + $0x18] sm:$0xff] }
   0xb   :  { %v31_v31 = vld [vmem:[%s2687_s0 + $0x10] sm:$0xff]  ;;  %v2130_v32 = vld [vmem:[%s2688_s2 + $0x38] sm:$0xff]   ;;  %v242_v33 = vld [vmem:[%s2689_s1 + $0x28] sm:$0xff] }
   0xc   :  { %1910 = vmatpush3.bf16.msra.mxu1 %v2039_v14  ;;  %1760 = vmatpush3.bf16.msra.mxu0 %v2039_v14  ;;  %v241_v34 = vld [vmem:[%s2689_s1 + $0x20] sm:$0xff]  ;;  %v34_v35 = vld [vmem:[%s2687_s0 + $0x28] sm:$0xff]  ;;  %v244_v37 = vld [vmem:[%s2689_s1 + $0x38] sm:$0xff] }
   0xd   :  { %1903 = vmatprep.subr.bf16.mxu1 %v2055_v17  ;;  %1761 = vmatprep.subr.bf16.mxu0 %v2055_v17  ;;  %v33_v36 = vld [vmem:[%s2687_s0 + $0x20] sm:$0xff]  ;;  %v243_v38 = vld [vmem:[%s2689_s1 + $0x30] sm:$0xff]  ;;  %v36_v39 = vld [vmem:[%s2687_s0 + $0x38] sm:$0xff] }
   0xe   :  { %131 = vperm.xlu1 %1920, %v52_v7   ;;  %128 = vperm.xlu0 %1919, %v51_v8   ;;  %v35_v40 = vld [vmem:[%s2687_s0 + $0x30] sm:$0xff]  ;;  %v246_v41 = vld [vmem:[%s2689_s1 + $0x48] sm:$0xff]  ;;  %v245_v42 = vld [vmem:[%s2689_s1 + $0x40] sm:$0xff] }
   0xf   :  { %v38_v43 = vld [vmem:[%s2687_s0 + $0x48] sm:$0xff]  ;;  %v37_v44 = vld [vmem:[%s2687_s0 + $0x40] sm:$0xff]  ;;  %v248_v45 = vld [vmem:[%s2689_s1 + $0x58] sm:$0xff] }
  0x10   :  { %1911 = vmatpush3.bf16.msra.mxu1 %v2055_v17  ;;  %1762 = vmatpush3.bf16.msra.mxu0 %v2055_v17  ;;  %v247_v46 = vld [vmem:[%s2689_s1 + $0x50] sm:$0xff]  ;;  %v40_v47 = vld [vmem:[%s2687_s0 + $0x58] sm:$0xff]  ;;  %v250_v49 = vld [vmem:[%s2689_s1 + $0x68] sm:$0xff] }
  0x11   :  { %1904 = vmatprep.subr.bf16.mxu1 %v2070_v20  ;;  %1763 = vmatprep.subr.bf16.mxu0 %v2070_v20  ;;  %v39_v48 = vld [vmem:[%s2687_s0 + $0x50] sm:$0xff]  ;;  %v249_v50 = vld [vmem:[%s2689_s1 + $0x60] sm:$0xff]  ;;  %v42_v51 = vld [vmem:[%s2687_s0 + $0x68] sm:$0xff] }
  0x12   :  { %137 = vperm.xlu1 %1920, %v54_v9   ;;  %134 = vperm.xlu0 %1919, %v53_v10   ;;  %v41_v52 = vld [vmem:[%s2687_s0 + $0x60] sm:$0xff]  ;;  %v252_v53 = vld [vmem:[%s2689_s1 + $0x78] sm:$0xff]  ;;  %v251_v54 = vld [vmem:[%s2689_s1 + $0x70] sm:$0xff]  ;;  %v27_v9 = vlaneseq }
  0x13   :  { %v44_v55 = vld [vmem:[%s2687_s0 + $0x78] sm:$0xff]  ;;  %v43_v56 = vld [vmem:[%s2687_s0 + $0x70] sm:$0xff]  ;;  %v254_v57 = vld [vmem:[%s2689_s1 + $0x88] sm:$0xff] }
  0x14   :  { %1912 = vmatpush3.bf16.msra.mxu1 %v2070_v20  ;;  %1764 = vmatpush3.bf16.msra.mxu0 %v2070_v20  ;;  %v253_v58 = vld [vmem:[%s2689_s1 + $0x80] sm:$0xff]  ;;  %v256_v59 = vld [vmem:[%s2689_s1 + $0x98] sm:$0xff]  ;;  %v255_v60 = vld [vmem:[%s2689_s1 + $0x90] sm:$0xff] }
  0x15   :  { %1905 = vmatprep.subr.bf16.mxu1 %v2085_v23  ;;  %1765 = vmatprep.subr.bf16.mxu0 %v2085_v23  ;;  %v258_v61 = vld [vmem:[%s2689_s1 + $0xa8] sm:$0xff]  ;;  %v257_v62 = vld [vmem:[%s2689_s1 + $0xa0] sm:$0xff]  ;;  %v260_v63 = vld [vmem:[%s2689_s1 + $0xb8] sm:$0xff] }
  0x16   :  { %143 = vperm.xlu1 %1920, %v56_v11   ;;  %140 = vperm.xlu0 %1919, %v55_v12   ;;  %v259_v0 = vld [vmem:[%s2689_s1 + $0xb0] sm:$0xff]  ;;  %v262_v1 = vld [vmem:[%s2689_s1 + $0xc8] sm:$0xff]  ;;  %v261_v2 = vld [vmem:[%s2689_s1 + $0xc0] sm:$0xff]  ;;  %v2260_v12 = vand.u32 127, %v27_v9 }
  0x17   :  { %v264_v3 = vld [vmem:[%s2689_s1 + $0xd8] sm:$0xff]  ;;  %v263_v4 = vld [vmem:[%s2689_s1 + $0xd0] sm:$0xff]  ;;  %v266_v5 = vld [vmem:[%s2689_s1 + $0xe8] sm:$0xff] }
  0x18   :  { %1913 = vmatpush3.bf16.msra.mxu1 %v2085_v23  ;;  %1766 = vmatpush3.bf16.msra.mxu0 %v2085_v23  ;;  %v265_v6 = vld [vmem:[%s2689_s1 + $0xe0] sm:$0xff]  ;;  %v268_v7 = vld [vmem:[%s2689_s1 + $0xf8] sm:$0xff]  ;;  %v267_v8 = vld [vmem:[%s2689_s1 + $0xf0] sm:$0xff] }
  0x19   :  { %1906 = vmatprep.subr.bf16.mxu1 %v2100_v26  ;;  %1767 = vmatprep.subr.bf16.mxu0 %v2100_v26 }
  0x1a   :  { %149 = vperm.xlu1 %1920, %v58_v15   ;;  %146 = vperm.xlu0 %1919, %v57_v16  }
  0x1c   :  { %1914 = vmatpush3.bf16.msra.mxu1 %v2100_v26  ;;  %1768 = vmatpush3.bf16.msra.mxu0 %v2100_v26 }
  0x1d   :  { %1907 = vmatprep.subr.bf16.mxu1 %v2115_v29  ;;  %1769 = vmatprep.subr.bf16.mxu0 %v2115_v29 }
  0x1e   :  { %155 = vperm.xlu1 %1920, %v60_v18   ;;  %152 = vperm.xlu0 %1919, %v59_v19   ;;  %v1954_v18 = vmov 1.0|1.0  }
  0x20   :  { %1915 = vmatpush3.bf16.msra.mxu1 %v2115_v29  ;;  %1770 = vmatpush3.bf16.msra.mxu0 %v2115_v29 }
  0x21   :  { %1908 = vmatprep.subr.bf16.mxu1 %v2130_v32  ;;  %1771 = vmatprep.subr.bf16.mxu0 %v2130_v32 }
  0x22   :  { %273 = vperm.xlu1 %1920, %v238_v21   ;;  %270 = vperm.xlu0 %1919, %v237_v22  }
  0x24   :  { %1916 = vmatpush3.bf16.msra.mxu1 %v2130_v32  ;;  %1772 = vmatpush3.bf16.msra.mxu0 %v2130_v32 }
  0x25   :  { %1805 = vmatprep.subr.bf16.mxu1 %v2034_v13 }
  0x26   :  { %65 = vperm.xlu1 %1920, %v30_v24   ;;  %62 = vperm.xlu0 %1919, %v29_v25  }
  0x2a   :  { %279 = vperm.xlu1 %1920, %v240_v27   ;;  %276 = vperm.xlu0 %1919, %v239_v28  }
  0x2e   :  { %71 = vperm.xlu1 %1920, %v32_v30   ;;  %68 = vperm.xlu0 %1919, %v31_v31  }
  0x32   :  { %285 = vperm.xlu1 %1920, %v242_v33   ;;  %282 = vperm.xlu0 %1919, %v241_v34  }
  0x36   :  { %77 = vperm.xlu1 %1920, %v34_v35   ;;  %74 = vperm.xlu0 %1919, %v33_v36  }
  0x3a   :  { %291 = vperm.xlu1 %1920, %v244_v37   ;;  %288 = vperm.xlu0 %1919, %v243_v38  }
  0x3e   :  { %83 = vperm.xlu1 %1920, %v36_v39   ;;  %80 = vperm.xlu0 %1919, %v35_v40  }
  0x42   :  { %297 = vperm.xlu1 %1920, %v246_v41   ;;  %294 = vperm.xlu0 %1919, %v245_v42  }
  0x46   :  { %89 = vperm.xlu1 %1920, %v38_v43   ;;  %86 = vperm.xlu0 %1919, %v37_v44  }
  0x4a   :  { %303 = vperm.xlu1 %1920, %v248_v45   ;;  %300 = vperm.xlu0 %1919, %v247_v46  }
  0x4e   :  { %95 = vperm.xlu1 %1920, %v40_v47   ;;  %92 = vperm.xlu0 %1919, %v39_v48  }
  0x52   :  { %309 = vperm.xlu1 %1920, %v250_v49   ;;  %306 = vperm.xlu0 %1919, %v249_v50  }
  0x56   :  { %101 = vperm.xlu1 %1920, %v42_v51   ;;  %98 = vperm.xlu0 %1919, %v41_v52  }
  0x5a   :  { %315 = vperm.xlu1 %1920, %v252_v53   ;;  %312 = vperm.xlu0 %1919, %v251_v54  }
  0x5e   :  { %107 = vperm.xlu1 %1920, %v44_v55   ;;  %104 = vperm.xlu0 %1919, %v43_v56  }
  0x62   :  { %321 = vperm.xlu1 %1920, %v254_v57   ;;  %318 = vperm.xlu0 %1919, %v253_v58  }
  0x66   :  { %327 = vperm.xlu1 %1920, %v256_v59   ;;  %324 = vperm.xlu0 %1919, %v255_v60  }
  0x6a   :  { %333 = vperm.xlu1 %1920, %v258_v61   ;;  %330 = vperm.xlu0 %1919, %v257_v62  }
  0x6e   :  { %339 = vperm.xlu1 %1920, %v260_v63   ;;  %336 = vperm.xlu0 %1919, %v259_v0   ;;  %v1929_v0 = vld [vmem:[%s2690_s3 + $0x40] sm:$0xff]  }
  0x6f   :  { %1621 = vmatprep.subr.bf16.mxu0 %v1929_v0 }
  0x72   :  { %345 = vperm.xlu1 %1920, %v262_v1   ;;  %342 = vperm.xlu0 %1919, %v261_v2  }
  0x76   :  { %351 = vperm.xlu1 %1920, %v264_v3   ;;  %348 = vperm.xlu0 %1919, %v263_v4   ;;  %v1930_v3 = vld [vmem:[%s2690_s3] sm:$0xff]   ;;  %v1931_v4 = vld [vmem:[%s2690_s3 + $0x48] sm:$0xff]  }
  0x7a   :  { %357 = vperm.xlu1 %1920, %v266_v5   ;;  %354 = vperm.xlu0 %1919, %v265_v6  }
  0x7e   :  { %363 = vperm.xlu1 %1920, %v268_v7   ;;  %360 = vperm.xlu0 %1919, %v267_v8   ;;  %v1932_v7 = vld [vmem:[%s2690_s3 + $0x8] sm:$0xff]   ;;  %v1933_v8 = vld [vmem:[%s2690_s3 + $0x50] sm:$0xff]  }
  0x81   :  { %v117_v10 = vpop.permute.xlu1 %116  ;;  %v111_v11 = vpop.permute.xlu0 %110 }
  0x82   :  { %vm175_vm0 = vcmp.eq.s32.totalorder %v117_v10, %v2260_v12  ;;  %vm173_vm3 = vcmp.eq.s32.totalorder %v111_v11, %v2260_v12  ;;  %v1934_v11 = vld [vmem:[%s2690_s3 + $0x10] sm:$0xff]  }
  0x85   :  { %v120_v15 = vpop.permute.xlu1 %119  ;;  %v114_v16 = vpop.permute.xlu0 %113 }
  0x86   :  { %vm176_vm1 = vcmp.eq.s32.totalorder %v120_v15, %v2260_v12  ;;  %vm174_vm2 = vcmp.eq.s32.totalorder %v114_v16, %v2260_v12  ;;  %v1935_v15 = vld [vmem:[%s2690_s3 + $0x58] sm:$0xff]  }
  0x87   :  { %vm1501_vm4 = vmpackc.low %vm176_vm1, %vm175_vm0 }
  0x88   :  { %vm1499_vm5 = vmpackc.low %vm174_vm2, %vm173_vm3 }
  0x89   :  { %1789 = vmatprep.mubr.msk.bf16.mxu1 %vm1499_vm5, %v1954_v18  ;;  %v126_v19 = vpop.permute.xlu1 %125  ;;  %v123_v21 = vpop.permute.xlu0 %122 }
  0x8a   :  { %vm178_vm6 = vcmp.eq.s32.totalorder %v126_v19, %v2260_v12  ;;  %1790 = vmatmul.mubr.msk.bf16.vlgmr.msra.gmra.mrb[0].mxu1 %vm1501_vm4, %v1954_v18  ;;  %vm177_vm7 = vcmp.eq.s32.totalorder %v123_v21, %v2260_v12  ;;  %v1936_v21 = vld [vmem:[%s2690_s3 + $0x18] sm:$0xff]  }
  0x8b   :  { %vm1503_vm8 = vmpackc.low %vm178_vm6, %vm177_vm7  ;;  %1806 = vmatpush3.bf16.msra.mxu1 %v2034_v13 }
  0x8c   :  { %1793 = vmatprep.mubr.msk.bf16.mxu1 %vm1503_vm8, %v1954_v18  ;;  %1807 = vmatprep.subr.bf16.mxu1 %v2039_v14 }
  0x8d   :  { %v132_v22 = vpop.permute.xlu1 %131  ;;  %v129_v24 = vpop.permute.xlu0 %128 }
  0x8e   :  { %vm180_vm9 = vcmp.eq.s32.totalorder %v132_v22, %v2260_v12  ;;  %vm179_vm10 = vcmp.eq.s32.totalorder %v129_v24, %v2260_v12  ;;  %v1937_v22 = vld [vmem:[%s2690_s3 + $0x60] sm:$0xff]  }
  0x8f   :  { %vm1505_vm11 = vmpackc.low %vm180_vm9, %vm179_vm10  ;;  %1808 = vmatpush3.bf16.msra.mxu1 %v2039_v14 }
  0x90   :  { %1809 = vmatprep.subr.bf16.mxu1 %v2055_v17 }
  0x91   :  { %v138_v25 = vpop.permute.xlu1 %137  ;;  %v135_v27 = vpop.permute.xlu0 %134 }
  0x92   :  { %vm182_vm12 = vcmp.eq.s32.totalorder %v138_v25, %v2260_v12  ;;  %1794 = vmatmul.mubr.msk.bf16.gmra.mrb[4].mxu1 %vm1505_vm11, %v1954_v18  ;;  %vm181_vm13 = vcmp.eq.s32.totalorder %v135_v27, %v2260_v12  ;;  %v1938_v27 = vld [vmem:[%s2690_s3 + $0x20] sm:$0xff]  }
  0x93   :  { %vm1507_vm14 = vmpackc.low %vm182_vm12, %vm181_vm13  ;;  %1810 = vmatpush3.bf16.msra.mxu1 %v2055_v17 }
  0x94   :  { %1797 = vmatprep.mubr.msk.bf16.mxu1 %vm1507_vm14, %v1954_v18  ;;  %1811 = vmatprep.subr.bf16.mxu1 %v2070_v20 }
  0x95   :  { %v144_v13 = vpop.permute.xlu1 %143  ;;  %v141_v28 = vpop.permute.xlu0 %140 }
  0x96   :  { %vm184_vm15 = vcmp.eq.s32.totalorder %v144_v13, %v2260_v12  ;;  %vm183_vm0 = vcmp.eq.s32.totalorder %v141_v28, %v2260_v12  ;;  %v1939_v13 = vld [vmem:[%s2690_s3 + $0x68] sm:$0xff]  }
  0x97   :  { %vm1509_vm1 = vmpackc.low %vm184_vm15, %vm183_vm0  ;;  %1812 = vmatpush3.bf16.msra.mxu1 %v2070_v20  ;;  %v1940_v28 = vld [vmem:[%s2690_s3 + $0x28] sm:$0xff]  }
  0x98   :  { %1813 = vmatprep.subr.bf16.mxu1 %v2085_v23 }
  0x99   :  { %v150_v14 = vpop.permute.xlu1 %149  ;;  %v147_v30 = vpop.permute.xlu0 %146 }
  0x9a   :  { %vm186_vm2 = vcmp.eq.s32.totalorder %v150_v14, %v2260_v12  ;;  %1798 = vmatmul.mubr.msk.bf16.gmra.mrb[8].mxu1 %vm1509_vm1, %v1954_v18  ;;  %vm185_vm3 = vcmp.eq.s32.totalorder %v147_v30, %v2260_v12 }
  0x9b   :  { %vm1511_vm4 = vmpackc.low %vm186_vm2, %vm185_vm3  ;;  %1814 = vmatpush3.bf16.msra.mxu1 %v2085_v23 }
  0x9c   :  { %1801 = vmatprep.mubr.msk.bf16.mxu1 %vm1511_vm4, %v1954_v18  ;;  %1815 = vmatprep.subr.bf16.mxu1 %v2100_v26 }
  0x9d   :  { %v156_v17 = vpop.permute.xlu1 %155  ;;  %v153_v31 = vpop.permute.xlu0 %152 }
  0x9e   :  { %vm188_vm5 = vcmp.eq.s32.totalorder %v156_v17, %v2260_v12  ;;  %vm187_vm6 = vcmp.eq.s32.totalorder %v153_v31, %v2260_v12  ;;  %v1941_v17 = vld [vmem:[%s2690_s3 + $0x70] sm:$0xff]  }
  0x9f   :  { %vm1513_vm7 = vmpackc.low %vm188_vm5, %vm187_vm6  ;;  %1816 = vmatpush3.bf16.msra.mxu1 %v2100_v26  ;;  %v1942_v31 = vld [vmem:[%s2690_s3 + $0x30] sm:$0xff]  }
  0xa0   :  { %1817 = vmatprep.subr.bf16.mxu1 %v2115_v29 }
  0xa1   :  { %v274_v20 = vpop.permute.xlu1 %273  ;;  %v271_v33 = vpop.permute.xlu0 %270 }
  0xa2   :  { %vm366_vm8 = vcmp.eq.s32.totalorder %v274_v20, %v2260_v12  ;;  %1802 = vmatmul.mubr.msk.bf16.gmra.mrb[12].mxu1 %vm1513_vm7, %v1954_v18  ;;  %vm365_vm9 = vcmp.eq.s32.totalorder %v271_v33, %v2260_v12  ;;  %v1943_v20 = vld [vmem:[%s2690_s3 + $0x78] sm:$0xff]  }
  0xa3   :  { %vm1515_vm10 = vmpackc.low %vm366_vm8, %vm365_vm9  ;;  %1818 = vmatpush3.bf16.msra.mxu1 %v2115_v29 }
  0xa4   :  { %1821 = vmatprep.mubr.msk.bf16.mxu1 %vm1515_vm10, %v1954_v18  ;;  %1819 = vmatprep.subr.bf16.mxu1 %v2130_v32 }
  0xa5   :  { %v66_v23 = vpop.permute.xlu1 %65  ;;  %v63_v34 = vpop.permute.xlu0 %62 }
  0xa6   :  { %vm158_vm11 = vcmp.eq.s32.totalorder %v66_v23, %v2260_v12  ;;  %vm157_vm12 = vcmp.eq.s32.totalorder %v63_v34, %v2260_v12 }
  0xa7   :  { %vm1483_vm13 = vmpackc.low %vm158_vm11, %vm157_vm12  ;;  %1820 = vmatpush3.bf16.msra.mxu1 %v2130_v32 }
  0xa8   :  { %1773 = vmatprep.mubr.msk.bf16.mxu0 %vm1483_vm13, %v1954_v18 }
  0xa9   :  { %v280_v26 = vpop.permute.xlu1 %279  ;;  %v277_v35 = vpop.permute.xlu0 %276 }
  0xaa   :  { %vm368_vm14 = vcmp.eq.s32.totalorder %v280_v26, %v2260_v12  ;;  %vm367_vm15 = vcmp.eq.s32.totalorder %v277_v35, %v2260_v12 }
  0xab   :  { %vm1517_vm0 = vmpackc.low %vm368_vm14, %vm367_vm15 }
  0xac   :  { %1822 = vmatmul.mubr.msk.bf16.vlgmr.msra.gmra.mrb[16].mxu1 %vm1517_vm0, %v1954_v18 }
  0xad   :  { %v72_v29 = vpop.permute.xlu1 %71  ;;  %v69_v36 = vpop.permute.xlu0 %68 }
  0xae   :  { %vm160_vm1 = vcmp.eq.s32.totalorder %v72_v29, %v2260_v12  ;;  %vm159_vm2 = vcmp.eq.s32.totalorder %v69_v36, %v2260_v12 }
  0xaf   :  { %vm1485_vm3 = vmpackc.low %vm160_vm1, %vm159_vm2 }
  0xb0   :  { %1774 = vmatmul.mubr.msk.bf16.vlgmr.msra.gmra.mrb[0].mxu0 %vm1485_vm3, %v1954_v18 }
  0xb1   :  { %v286_v32 = vpop.permute.xlu1 %285  ;;  %v283_v37 = vpop.permute.xlu0 %282  ;;  %1622 = vmatpush3.bf16.msra.mxu0 %v1930_v3 }
  0xb2   :  { %vm370_vm4 = vcmp.eq.s32.totalorder %v286_v32, %v2260_v12  ;;  %vm369_vm5 = vcmp.eq.s32.totalorder %v283_v37, %v2260_v12  ;;  %1623 = vmatprep.subr.bf16.mxu0 %v1931_v4 }
  0xb3   :  { %vm1519_vm6 = vmpackc.low %vm370_vm4, %vm369_vm5 }
  0xb4   :  { %1825 = vmatprep.mubr.msk.bf16.mxu1 %vm1519_vm6, %v1954_v18 }
  0xb5   :  { %v78_v38 = vpop.permute.xlu1 %77  ;;  %v75_v39 = vpop.permute.xlu0 %74  ;;  %1624 = vmatpush3.bf16.msra.mxu0 %v1932_v7 }
  0xb6   :  { %vm162_vm7 = vcmp.eq.s32.totalorder %v78_v38, %v2260_v12  ;;  %vm161_vm8 = vcmp.eq.s32.totalorder %v75_v39, %v2260_v12  ;;  %1625 = vmatprep.subr.bf16.mxu0 %v1933_v8 }
  0xb7   :  { %vm1487_vm9 = vmpackc.low %vm162_vm7, %vm161_vm8 }
  0xb8   :  { %1777 = vmatprep.mubr.msk.bf16.mxu0 %vm1487_vm9, %v1954_v18 }
  0xb9   :  { %v292_v40 = vpop.permute.xlu1 %291  ;;  %v289_v41 = vpop.permute.xlu0 %288  ;;  %1626 = vmatpush3.bf16.msra.mxu0 %v1934_v11 }
  0xba   :  { %vm372_vm10 = vcmp.eq.s32.totalorder %v292_v40, %v2260_v12  ;;  %vm371_vm11 = vcmp.eq.s32.totalorder %v289_v41, %v2260_v12  ;;  %1627 = vmatprep.subr.bf16.mxu0 %v1935_v15 }
  0xbb   :  { %vm1521_vm12 = vmpackc.low %vm372_vm10, %vm371_vm11 }
  0xbc   :  { %1826 = vmatmul.mubr.msk.bf16.gmra.mrb[20].mxu1 %vm1521_vm12, %v1954_v18 }
  0xbd   :  { %v84_v42 = vpop.permute.xlu1 %83  ;;  %v81_v43 = vpop.permute.xlu0 %80  ;;  %1628 = vmatpush3.bf16.msra.mxu0 %v1936_v21 }
  0xbe   :  { %vm164_vm13 = vcmp.eq.s32.totalorder %v84_v42, %v2260_v12  ;;  %vm163_vm14 = vcmp.eq.s32.totalorder %v81_v43, %v2260_v12  ;;  %1629 = vmatprep.subr.bf16.mxu0 %v1937_v22 }
  0xbf   :  { %vm1489_vm15 = vmpackc.low %vm164_vm13, %vm163_vm14 }
  0xc0   :  { %1778 = vmatmul.mubr.msk.bf16.gmra.mrb[4].mxu0 %vm1489_vm15, %v1954_v18 }
  0xc1   :  { %v298_v44 = vpop.permute.xlu1 %297  ;;  %v295_v45 = vpop.permute.xlu0 %294  ;;  %1630 = vmatpush3.bf16.msra.mxu0 %v1938_v27 }
  0xc2   :  { %vm374_vm0 = vcmp.eq.s32.totalorder %v298_v44, %v2260_v12  ;;  %vm373_vm1 = vcmp.eq.s32.totalorder %v295_v45, %v2260_v12  ;;  %1631 = vmatprep.subr.bf16.mxu0 %v1939_v13 }
  0xc3   :  { %vm1523_vm2 = vmpackc.low %vm374_vm0, %vm373_vm1 }
  0xc4   :  { %1829 = vmatprep.mubr.msk.bf16.mxu1 %vm1523_vm2, %v1954_v18 }
  0xc5   :  { %v90_v46 = vpop.permute.xlu1 %89  ;;  %v87_v47 = vpop.permute.xlu0 %86  ;;  %1632 = vmatpush3.bf16.msra.mxu0 %v1940_v28 }
  0xc6   :  { %vm166_vm3 = vcmp.eq.s32.totalorder %v90_v46, %v2260_v12  ;;  %vm165_vm4 = vcmp.eq.s32.totalorder %v87_v47, %v2260_v12  ;;  %1633 = vmatprep.subr.bf16.mxu0 %v1941_v17 }
  0xc7   :  { %vm1491_vm5 = vmpackc.low %vm166_vm3, %vm165_vm4 }
  0xc8   :  { %1781 = vmatprep.mubr.msk.bf16.mxu0 %vm1491_vm5, %v1954_v18 }
  0xc9   :  { %v304_v48 = vpop.permute.xlu1 %303  ;;  %v301_v49 = vpop.permute.xlu0 %300  ;;  %1634 = vmatpush3.bf16.msra.mxu0 %v1942_v31 }
  0xca   :  { %vm376_vm6 = vcmp.eq.s32.totalorder %v304_v48, %v2260_v12  ;;  %vm375_vm7 = vcmp.eq.s32.totalorder %v301_v49, %v2260_v12  ;;  %1635 = vmatprep.subr.bf16.mxu0 %v1943_v20 }
  0xcb   :  { %vm1525_vm8 = vmpackc.low %vm376_vm6, %vm375_vm7 }
  0xcc   :  { %1830 = vmatmul.mubr.msk.bf16.gmra.mrb[24].mxu1 %vm1525_vm8, %v1954_v18 }
  0xcd   :  { %v96_v50 = vpop.permute.xlu1 %95  ;;  %v93_v51 = vpop.permute.xlu0 %92 }
  0xce   :  { %vm168_vm9 = vcmp.eq.s32.totalorder %v96_v50, %v2260_v12  ;;  %vm167_vm10 = vcmp.eq.s32.totalorder %v93_v51, %v2260_v12 }
  0xcf   :  { %vm1493_vm11 = vmpackc.low %vm168_vm9, %vm167_vm10 }
  0xd0   :  { %1782 = vmatmul.mubr.msk.bf16.gmra.mrb[8].mxu0 %vm1493_vm11, %v1954_v18 }
  0xd1   :  { %v310_v52 = vpop.permute.xlu1 %309  ;;  %v307_v53 = vpop.permute.xlu0 %306 }
  0xd2   :  { %vm378_vm12 = vcmp.eq.s32.totalorder %v310_v52, %v2260_v12  ;;  %vm377_vm13 = vcmp.eq.s32.totalorder %v307_v53, %v2260_v12 }
  0xd3   :  { %vm1527_vm14 = vmpackc.low %vm378_vm12, %vm377_vm13 }
  0xd4   :  { %1833 = vmatprep.mubr.msk.bf16.mxu1 %vm1527_vm14, %v1954_v18 }
  0xd5   :  { %v102_v54 = vpop.permute.xlu1 %101  ;;  %v99_v55 = vpop.permute.xlu0 %98 }
  0xd6   :  { %vm170_vm15 = vcmp.eq.s32.totalorder %v102_v54, %v2260_v12  ;;  %vm169_vm0 = vcmp.eq.s32.totalorder %v99_v55, %v2260_v12 }
  0xd7   :  { %vm1495_vm1 = vmpackc.low %vm170_vm15, %vm169_vm0 }
  0xd8   :  { %1785 = vmatprep.mubr.msk.bf16.mxu0 %vm1495_vm1, %v1954_v18 }
  0xd9   :  { %v316_v56 = vpop.permute.xlu1 %315  ;;  %v313_v57 = vpop.permute.xlu0 %312 }
  0xda   :  { %vm380_vm2 = vcmp.eq.s32.totalorder %v316_v56, %v2260_v12  ;;  %vm379_vm3 = vcmp.eq.s32.totalorder %v313_v57, %v2260_v12  ;;  %v1945_v57 = vld [vmem:[%s2691_s5] sm:$0xff]  }
  0xdb   :  { %vm1529_vm4 = vmpackc.low %vm380_vm2, %vm379_vm3  ;;  %1853 = vmatprep.subr.bf16.mxu1 %v1945_v57 }
  0xdc   :  { %1834 = vmatmul.mubr.msk.bf16.gmra.mrb[28].mxu1 %vm1529_vm4, %v1954_v18 }
  0xdd   :  { %v108_v58 = vpop.permute.xlu1 %107  ;;  %v105_v59 = vpop.permute.xlu0 %104  ;;  %1854 = vmatpush3.bf16.msra.mxu1 %v1945_v57 }
  0xde   :  { %vm172_vm5 = vcmp.eq.s32.totalorder %v108_v58, %v2260_v12  ;;  %vm171_vm6 = vcmp.eq.s32.totalorder %v105_v59, %v2260_v12 }
  0xdf   :  { %vm1497_vm7 = vmpackc.low %vm172_vm5, %vm171_vm6 }
  0xe0   :  { %1786 = vmatmul.mubr.msk.bf16.gmra.mrb[12].mxu0 %vm1497_vm7, %v1954_v18 }
  0xe1   :  { %v322_v60 = vpop.permute.xlu1 %321  ;;  %v319_v61 = vpop.permute.xlu0 %318 }
  0xe2   :  { %vm382_vm8 = vcmp.eq.s32.totalorder %v322_v60, %v2260_v12  ;;  %vm381_vm9 = vcmp.eq.s32.totalorder %v319_v61, %v2260_v12  ;;  %v1946_v60 = vld [vmem:[%s2691_s5 + $0x8] sm:$0xff]  }
  0xe3   :  { %vm1531_vm10 = vmpackc.low %vm382_vm8, %vm381_vm9  ;;  %1855 = vmatprep.subr.bf16.mxu1 %v1946_v60 }
  0xe4   :  { %1837 = vmatprep.mubr.msk.bf16.mxu1 %vm1531_vm10, %v1954_v18  ;;  %1856 = vmatpush3.bf16.msra.mxu1 %v1946_v60 }
  0xe5   :  { %v328_v62 = vpop.permute.xlu1 %327  ;;  %v325_v63 = vpop.permute.xlu0 %324 }
  0xe6   :  { %vm384_vm11 = vcmp.eq.s32.totalorder %v328_v62, %v2260_v12  ;;  %vm383_vm12 = vcmp.eq.s32.totalorder %v325_v63, %v2260_v12 }
  0xe7   :  { %vm1533_vm13 = vmpackc.low %vm384_vm11, %vm383_vm12 }
  0xe8   :  { %1838 = vmatmul.mubr.msk.bf16.gmra.mrb[32].mxu1 %vm1533_vm13, %v1954_v18 }
  0xe9   :  { %v334_v1 = vpop.permute.xlu1 %333  ;;  %v331_v2 = vpop.permute.xlu0 %330 }
  0xea   :  { %vm386_vm14 = vcmp.eq.s32.totalorder %v334_v1, %v2260_v12  ;;  %vm385_vm15 = vcmp.eq.s32.totalorder %v331_v2, %v2260_v12  ;;  %v1947_v1 = vld [vmem:[%s2691_s5 + $0x10] sm:$0xff]  }
  0xeb   :  { %vm1535_vm0 = vmpackc.low %vm386_vm14, %vm385_vm15  ;;  %1857 = vmatprep.subr.bf16.mxu1 %v1947_v1 }
  0xec   :  { %1841 = vmatprep.mubr.msk.bf16.mxu1 %vm1535_vm0, %v1954_v18  ;;  %1858 = vmatpush3.bf16.msra.mxu1 %v1947_v1 }
  0xed   :  { %v340_v5 = vpop.permute.xlu1 %339  ;;  %v337_v6 = vpop.permute.xlu0 %336 }
  0xee   :  { %vm388_vm1 = vcmp.eq.s32.totalorder %v340_v5, %v2260_v12  ;;  %vm387_vm2 = vcmp.eq.s32.totalorder %v337_v6, %v2260_v12 }
  0xef   :  { %vm1537_vm3 = vmpackc.low %vm388_vm1, %vm387_vm2 }
  0xf0   :  { %1842 = vmatmul.mubr.msk.bf16.gmra.mrb[36].mxu1 %vm1537_vm3, %v1954_v18 }
  0xf1   :  { %v346_v9 = vpop.permute.xlu1 %345  ;;  %v343_v10 = vpop.permute.xlu0 %342 }
  0xf2   :  { %vm390_vm4 = vcmp.eq.s32.totalorder %v346_v9, %v2260_v12  ;;  %vm389_vm5 = vcmp.eq.s32.totalorder %v343_v10, %v2260_v12 }
  0xf3   :  { %vm1539_vm6 = vmpackc.low %vm390_vm4, %vm389_vm5 }
  0xf4   :  { %1845 = vmatprep.mubr.msk.bf16.mxu1 %vm1539_vm6, %v1954_v18 }
  0xf5   :  { %v352_v16 = vpop.permute.xlu1 %351  ;;  %v349_v19 = vpop.permute.xlu0 %348 }
  0xf6   :  { %vm392_vm7 = vcmp.eq.s32.totalorder %v352_v16, %v2260_v12  ;;  %vm391_vm8 = vcmp.eq.s32.totalorder %v349_v19, %v2260_v12 }
  0xf7   :  { %vm1541_vm9 = vmpackc.low %vm392_vm7, %vm391_vm8 }
  0xf8   :  { %1846 = vmatmul.mubr.msk.bf16.gmra.mrb[40].mxu1 %vm1541_vm9, %v1954_v18 }
  0xf9   :  { %v358_v24 = vpop.permute.xlu1 %357  ;;  %v355_v25 = vpop.permute.xlu0 %354 }
  0xfa   :  { %vm394_vm10 = vcmp.eq.s32.totalorder %v358_v24, %v2260_v12  ;;  %vm393_vm11 = vcmp.eq.s32.totalorder %v355_v25, %v2260_v12 }
  0xfb   :  { %vm1543_vm12 = vmpackc.low %vm394_vm10, %vm393_vm11 }
  0xfc   :  { %1849 = vmatprep.mubr.msk.bf16.mxu1 %vm1543_vm12, %v1954_v18 }
  0xfd   :  { %v364_v14 = vpop.permute.xlu1 %363  ;;  %v361_v30 = vpop.permute.xlu0 %360 }
  0xfe   :  { %vm396_vm13 = vcmp.eq.s32.totalorder %v364_v14, %v2260_v12  ;;  %vm395_vm14 = vcmp.eq.s32.totalorder %v361_v30, %v2260_v12  ;;  %v1944_v12 = vld [vmem:[%s2690_s3 + $0x38] sm:$0xff]  }
  0xff   :  { %vm1545_vm15 = vmpackc.low %vm396_vm13, %vm395_vm14  ;;  %1636 = vmatpush3.bf16.msra.mxu0 %v1944_v12 }
 0x100   :  { %1850 = vmatmul.mubr.msk.bf16.gmra.mrb[44].mxu1 %vm1545_vm15, %v1954_v18 }
 0x15d   :  { %v2421_v18 = vpop.f32.mrb[0].mxu1 }
 0x15e   :  { %v2423_v33 = vpop.f32.mrb[1].mxu1 }
 0x15f   :  { %v2425_v23 = vpop.f32.mrb[2].mxu1 }
 0x160   :  { %v679_v34 = vpack.c.bf16 %v2425_v23, %v2421_v18  ;;  %v2429_v26 = vpop.f32.mrb[3].mxu1  ;;  %v1949_v18 = vld [vmem:[%s2691_s5 + $0x20] sm:$0xff]   ;;  %v1950_v23 = vld [vmem:[%s2691_s5 + $0x28] sm:$0xff]  }
 0x161   :  { %v678_v35 = vpack.c.bf16 %v2429_v26, %v2423_v33  ;;  %v1948_v33 = vld [vmem:[%s2691_s5 + $0x18] sm:$0xff]  }
 0x162   :  { %1859 = vmatprep.subr.bf16.mxu1 %v1948_v33  ;;  %v1952_v26 = vld [vmem:[%s2691_s5 + $0x38] sm:$0xff]  }
 0x163   :  { %1860 = vmatpush3.bf16.msra.mxu1 %v1948_v33 }
 0x164   :  { %1861 = vmatprep.subr.bf16.mxu1 %v1949_v18 }
 0x165   :  { %v2433_v29 = vpop.f32.mrb[4].mxu1 }
 0x166   :  { %v2435_v36 = vpop.f32.mrb[5].mxu1 }
 0x167   :  { %v2437_v32 = vpop.f32.mrb[6].mxu1  ;;  %1862 = vmatpush3.bf16.msra.mxu1 %v1949_v18 }
 0x168   :  { %v681_v37 = vpack.c.bf16 %v2437_v32, %v2433_v29  ;;  %v2441_v38 = vpop.f32.mrb[7].mxu1  ;;  %1863 = vmatprep.subr.bf16.mxu1 %v1950_v23  ;;  %v2520_v29 = vld [vmem:[%s2692_s4] ss:$0 sm:$0xff] }
 0x169   :  { %v680_v39 = vpack.c.bf16 %v2441_v38, %v2435_v36 }
 0x16b   :  { %1864 = vmatpush3.bf16.msra.mxu1 %v1950_v23 }
 0x16d   :  { %v2445_v40 = vpop.f32.mrb[8].mxu1 }
 0x16e   :  { %v2447_v41 = vpop.f32.mrb[9].mxu1 }
 0x16f   :  { %v2449_v42 = vpop.f32.mrb[10].mxu1 }
 0x170   :  { %v683_v43 = vpack.c.bf16 %v2449_v42, %v2445_v40  ;;  %v2453_v44 = vpop.f32.mrb[11].mxu1 }
 0x171   :  { %v682_v45 = vpack.c.bf16 %v2453_v44, %v2447_v41 }
 0x175   :  { %v2457_v46 = vpop.f32.mrb[12].mxu1 }
 0x176   :  { %v2459_v47 = vpop.f32.mrb[13].mxu1 }
 0x177   :  { %v2461_v48 = vpop.f32.mrb[14].mxu1 }
 0x178   :  { %v685_v49 = vpack.c.bf16 %v2461_v48, %v2457_v46  ;;  %v2465_v50 = vpop.f32.mrb[15].mxu1 }
 0x179   :  { %v684_v51 = vpack.c.bf16 %v2465_v50, %v2459_v47 }
 0x17f   :  { %v1823_v52 = vpop.f32.mrb[16].mxu1 }
 0x180   :  { %v720_v53 = vpop.f32.mrb[17].mxu1 }
 0x181   :  { %v1824_v54 = vpop.f32.mrb[18].mxu1 }
 0x182   :  { %v848_v55 = vpack.c.bf16 %v1824_v54, %v1823_v52  ;;  %v723_v56 = vpop.f32.mrb[19].mxu1 }
 0x183   :  { %v847_v58 = vpack.c.bf16 %v723_v56, %v720_v53  ;;  %v1775_v59 = vpop.f32.mrb[0].mxu0 }
 0x184   :  { %v543_v61 = vpop.f32.mrb[1].mxu0 }
 0x185   :  { %v1776_v62 = vpop.f32.mrb[2].mxu0  ;;  %1030 = vmatprep.mubr.bf16.mxu0 %v847_v58 }
 0x186   :  { %v671_v63 = vpack.c.bf16 %v1776_v62, %v1775_v59  ;;  %v546_v0 = vpop.f32.mrb[3].mxu0 }
 0x187   :  { %v670_v2 = vpack.c.bf16 %v546_v0, %v543_v61 }
 0x189   :  { %1031 = vmatmul.mubr.bf16.vlgmr.msra.gmra.mrb[16].mxu0 %v670_v2 }
 0x18a   :  { %1038 = vmatprep.mubr.bf16.mxu0 %v848_v55 }
 0x18f   :  { %v1827_v3 = vpop.f32.mrb[20].mxu1 }
 0x190   :  { %v736_v4 = vpop.f32.mrb[21].mxu1 }
 0x191   :  { %v1828_v5 = vpop.f32.mrb[22].mxu1  ;;  %1039 = vmatmul.mubr.bf16.gmra.mrb[20].mxu0 %v671_v63 }
 0x192   :  { %v850_v6 = vpack.c.bf16 %v1828_v5, %v1827_v3  ;;  %v739_v7 = vpop.f32.mrb[23].mxu1 }
 0x193   :  { %v849_v8 = vpack.c.bf16 %v739_v7, %v736_v4  ;;  %v1779_v9 = vpop.f32.mrb[4].mxu0 }
 0x194   :  { %v559_v10 = vpop.f32.mrb[5].mxu0 }
 0x195   :  { %v1780_v11 = vpop.f32.mrb[6].mxu0  ;;  %1046 = vmatprep.mubr.bf16.mxu0 %v849_v8 }
 0x196   :  { %v673_v15 = vpack.c.bf16 %v1780_v11, %v1779_v9  ;;  %v562_v16 = vpop.f32.mrb[7].mxu0 }
 0x197   :  { %v672_v19 = vpack.c.bf16 %v562_v16, %v559_v10 }
 0x199   :  { %1047 = vmatmul.mubr.bf16.gmra.mrb[24].mxu0 %v672_v19 }
 0x19a   :  { %1054 = vmatprep.mubr.bf16.mxu0 %v850_v6 }
 0x19f   :  { %v1831_v21 = vpop.f32.mrb[24].mxu1 }
 0x1a0   :  { %v752_v22 = vpop.f32.mrb[25].mxu1 }
 0x1a1   :  { %v1832_v24 = vpop.f32.mrb[26].mxu1  ;;  %1055 = vmatmul.mubr.bf16.gmra.mrb[28].mxu0 %v673_v15 }
 0x1a2   :  { %v852_v25 = vpack.c.bf16 %v1832_v24, %v1831_v21  ;;  %v755_v27 = vpop.f32.mrb[27].mxu1 }
 0x1a3   :  { %v851_v13 = vpack.c.bf16 %v755_v27, %v752_v22  ;;  %v1783_v28 = vpop.f32.mrb[8].mxu0 }
 0x1a4   :  { %v575_v14 = vpop.f32.mrb[9].mxu0 }
 0x1a5   :  { %v1784_v30 = vpop.f32.mrb[10].mxu0  ;;  %1062 = vmatprep.mubr.bf16.mxu0 %v851_v13 }
 0x1a6   :  { %v675_v17 = vpack.c.bf16 %v1784_v30, %v1783_v28  ;;  %v578_v31 = vpop.f32.mrb[11].mxu0 }
 0x1a7   :  { %v674_v20 = vpack.c.bf16 %v578_v31, %v575_v14 }
 0x1a9   :  { %1063 = vmatmul.mubr.bf16.gmra.mrb[32].mxu0 %v674_v20 }
 0x1aa   :  { %1070 = vmatprep.mubr.bf16.mxu0 %v852_v25 }
 0x1af   :  { %v1835_v12 = vpop.f32.mrb[28].mxu1 }
 0x1b0   :  { %v768_v52 = vpop.f32.mrb[29].mxu1 }
 0x1b1   :  { %v1836_v53 = vpop.f32.mrb[30].mxu1  ;;  %1071 = vmatmul.mubr.bf16.gmra.mrb[36].mxu0 %v675_v17 }
 0x1b2   :  { %v854_v54 = vpack.c.bf16 %v1836_v53, %v1835_v12  ;;  %v771_v55 = vpop.f32.mrb[31].mxu1 }
 0x1b3   :  { %v853_v56 = vpack.c.bf16 %v771_v55, %v768_v52  ;;  %v1787_v57 = vpop.f32.mrb[12].mxu0 }
 0x1b4   :  { %v591_v58 = vpop.f32.mrb[13].mxu0 }
 0x1b5   :  { %v1788_v59 = vpop.f32.mrb[14].mxu0  ;;  %1078 = vmatprep.mubr.bf16.mxu0 %v853_v56 }
 0x1b6   :  { %v677_v60 = vpack.c.bf16 %v1788_v59, %v1787_v57  ;;  %v594_v61 = vpop.f32.mrb[15].mxu0 }
 0x1b7   :  { %v676_v62 = vpack.c.bf16 %v594_v61, %v591_v58 }
 0x1b9   :  { %1079 = vmatmul.mubr.bf16.gmra.mrb[40].mxu0 %v676_v62 }
 0x1ba   :  { %1086 = vmatprep.mubr.bf16.mxu0 %v854_v54 }
 0x1bb   :  { %v1839_v63 = vpop.f32.mrb[32].mxu1 }
 0x1bc   :  { %v784_v0 = vpop.f32.mrb[33].mxu1 }
 0x1bd   :  { %v1840_v1 = vpop.f32.mrb[34].mxu1 }
 0x1be   :  { %v856_v2 = vpack.c.bf16 %v1840_v1, %v1839_v63  ;;  %v787_v3 = vpop.f32.mrb[35].mxu1 }
 0x1bf   :  { %v855_v4 = vpack.c.bf16 %v787_v3, %v784_v0 }
 0x1c1   :  { %1087 = vmatmul.mubr.bf16.gmra.mrb[44].mxu0 %v677_v60 }
 0x1c2   :  { %1094 = vmatprep.mubr.bf16.mxu0 %v855_v4 }
 0x1c3   :  { %v1843_v5 = vpop.f32.mrb[36].mxu1 }
 0x1c4   :  { %v800_v6 = vpop.f32.mrb[37].mxu1 }
 0x1c5   :  { %v1844_v7 = vpop.f32.mrb[38].mxu1 }
 0x1c6   :  { %v858_v8 = vpack.c.bf16 %v1844_v7, %v1843_v5  ;;  %v803_v9 = vpop.f32.mrb[39].mxu1 }
 0x1c7   :  { %v857_v10 = vpack.c.bf16 %v803_v9, %v800_v6 }
 0x1c9   :  { %1095 = vmatmul.mubr.bf16.gmra.mrb[48].mxu0 %v678_v35 }
 0x1ca   :  { %1102 = vmatprep.mubr.bf16.mxu0 %v856_v2 }
 0x1cb   :  { %v1847_v11 = vpop.f32.mrb[40].mxu1 }
 0x1cc   :  { %v816_v15 = vpop.f32.mrb[41].mxu1 }
 0x1cd   :  { %v1848_v16 = vpop.f32.mrb[42].mxu1 }
 0x1ce   :  { %v860_v19 = vpack.c.bf16 %v1848_v16, %v1847_v11  ;;  %v819_v21 = vpop.f32.mrb[43].mxu1 }
 0x1cf   :  { %v859_v22 = vpack.c.bf16 %v819_v21, %v816_v15 }
 0x1d1   :  { %1103 = vmatmul.mubr.bf16.gmra.mrb[52].mxu0 %v679_v34  ;;  %v1951_v34 = vld [vmem:[%s2691_s5 + $0x30] sm:$0xff]  }
 0x1d2   :  { %1110 = vmatprep.mubr.bf16.mxu0 %v857_v10  ;;  %1865 = vmatprep.subr.bf16.mxu1 %v1951_v34 }
 0x1d3   :  { %v1851_v24 = vpop.f32.mrb[44].mxu1  ;;  %1866 = vmatpush3.bf16.msra.mxu1 %v1951_v34 }
 0x1d4   :  { %v832_v25 = vpop.f32.mrb[45].mxu1  ;;  %1867 = vmatprep.subr.bf16.mxu1 %v1952_v26 }
 0x1d5   :  { %v1852_v27 = vpop.f32.mrb[46].mxu1 }
 0x1d6   :  { %v862_v13 = vpack.c.bf16 %v1852_v27, %v1851_v24  ;;  %v835_v28 = vpop.f32.mrb[47].mxu1 }
 0x1d7   :  { %v861_v14 = vpack.c.bf16 %v835_v28, %v832_v25  ;;  %1868 = vmatpush3.bf16.msra.mxu1 %v1952_v26 }
 0x1d9   :  { %1111 = vmatmul.mubr.bf16.gmra.mrb[56].mxu0 %v680_v39 }
 0x1da   :  { %1118 = vmatprep.mubr.bf16.mxu0 %v858_v8 }
 0x1e1   :  { %1119 = vmatmul.mubr.bf16.gmra.mrb[60].mxu0 %v681_v37 }
 0x1e2   :  { %1126 = vmatprep.mubr.bf16.mxu0 %v859_v22 }
 0x1e9   :  { %1127 = vmatmul.mubr.bf16.gmra.mrb[64].mxu0 %v682_v45 }
 0x1ea   :  { %1134 = vmatprep.mubr.bf16.mxu0 %v860_v19 }
 0x1f1   :  { %1135 = vmatmul.mubr.bf16.gmra.mrb[68].mxu0 %v683_v43 }
 0x1f2   :  { %1142 = vmatprep.mubr.bf16.mxu0 %v861_v14 }
 0x1f9   :  { %1143 = vmatmul.mubr.bf16.gmra.mrb[72].mxu0 %v684_v51 }
 0x1fa   :  { %1150 = vmatprep.mubr.bf16.mxu0 %v862_v13 }
 0x201   :  { %1151 = vmatmul.mubr.bf16.gmra.mrb[76].mxu0 %v685_v49 }
 0x25c   :  { %v1637_v35 = vpop.f32.mrb[16].mxu0 }
 0x25d   :  { %v1638_v36 = vpop.f32.mrb[17].mxu0 }
 0x25e   :  { %v1639_v32 = vadd.f32 %v1638_v36, %v1637_v35  ;;  %v1640_v37 = vpop.f32.mrb[18].mxu0 }
 0x25f   :  { %v1641_v38 = vpop.f32.mrb[19].mxu0 }
 0x260   :  { %v1033_v39 = vadd.f32 %v1639_v32, %v2520_v29  ;;  %v1642_v40 = vadd.f32 %v1641_v38, %v1640_v37 }
 0x262   :  { %v1036_v41 = vadd.f32 %v1642_v40, %v2520_v29  ;;  %v1159_v42 = vmax.f32 %v1033_v39, 0.0 }
 0x264   :  { %v1160_v43 = vmax.f32 %v1036_v41, 0.0  ;;  %v1643_v44 = vpop.f32.mrb[20].mxu0 }
 0x265   :  { %v1644_v45 = vpop.f32.mrb[21].mxu0 }
 0x266   :  { %v1645_v46 = vadd.f32 %v1644_v45, %v1643_v44  ;;  %v1646_v47 = vpop.f32.mrb[22].mxu0  ;;  %v1191_v48 = vpack.c.bf16 %v1160_v43, %v1159_v42 }
 0x267   :  { %v1647_v49 = vpop.f32.mrb[23].mxu0 }
 0x268   :  { %v1041_v50 = vadd.f32 %v1645_v46, %v2520_v29  ;;  %v1648_v51 = vadd.f32 %v1647_v49, %v1646_v47  ;;  %1869 = vmatprep.mubr.bf16.mxu1 %v1191_v48 }
 0x26a   :  { %v1044_v30 = vadd.f32 %v1648_v51, %v2520_v29  ;;  %v1161_v17 = vmax.f32 %v1041_v50, 0.0 }
 0x26c   :  { %v1162_v31 = vmax.f32 %v1044_v30, 0.0  ;;  %v1649_v20 = vpop.f32.mrb[24].mxu0 }
 0x26d   :  { %v1650_v12 = vpop.f32.mrb[25].mxu0 }
 0x26e   :  { %v1192_v52 = vpack.c.bf16 %v1162_v31, %v1161_v17  ;;  %v1651_v53 = vadd.f32 %v1650_v12, %v1649_v20  ;;  %v1652_v54 = vpop.f32.mrb[26].mxu0 }
 0x26f   :  { %v1653_v55 = vpop.f32.mrb[27].mxu0 }
 0x270   :  { %v1049_v56 = vadd.f32 %v1651_v53, %v2520_v29  ;;  %v1654_v57 = vadd.f32 %v1653_v55, %v1652_v54  ;;  %1870 = vmatmul.mubr.bf16.vlgmr.msra.gmra.mrb[48].mxu1 %v1192_v52 }
 0x272   :  { %v1052_v58 = vadd.f32 %v1654_v57, %v2520_v29  ;;  %v1163_v59 = vmax.f32 %v1049_v56, 0.0 }
 0x274   :  { %v1164_v60 = vmax.f32 %v1052_v58, 0.0  ;;  %v1655_v61 = vpop.f32.mrb[28].mxu0 }
 0x275   :  { %v1656_v62 = vpop.f32.mrb[29].mxu0 }
 0x276   :  { %v1657_v63 = vadd.f32 %v1656_v62, %v1655_v61  ;;  %v1658_v0 = vpop.f32.mrb[30].mxu0  ;;  %v1193_v1 = vpack.c.bf16 %v1164_v60, %v1163_v59 }
 0x277   :  { %v1659_v2 = vpop.f32.mrb[31].mxu0 }
 0x278   :  { %v1057_v3 = vadd.f32 %v1657_v63, %v2520_v29  ;;  %v1660_v4 = vadd.f32 %v1659_v2, %v1658_v0  ;;  %1873 = vmatprep.mubr.bf16.mxu1 %v1193_v1 }
 0x27a   :  { %v1060_v5 = vadd.f32 %v1660_v4, %v2520_v29  ;;  %v1165_v6 = vmax.f32 %v1057_v3, 0.0 }
 0x27c   :  { %v1166_v7 = vmax.f32 %v1060_v5, 0.0  ;;  %v1661_v8 = vpop.f32.mrb[32].mxu0 }
 0x27d   :  { %v1662_v9 = vpop.f32.mrb[33].mxu0 }
 0x27e   :  { %v1663_v10 = vadd.f32 %v1662_v9, %v1661_v8  ;;  %v1664_v11 = vpop.f32.mrb[34].mxu0  ;;  %v1194_v15 = vpack.c.bf16 %v1166_v7, %v1165_v6 }
 0x27f   :  { %v1665_v16 = vpop.f32.mrb[35].mxu0 }
 0x280   :  { %v1065_v19 = vadd.f32 %v1663_v10, %v2520_v29  ;;  %v1666_v21 = vadd.f32 %v1665_v16, %v1664_v11  ;;  %1874 = vmatmul.mubr.bf16.gmra.mrb[52].mxu1 %v1194_v15 }
 0x282   :  { %v1068_v22 = vadd.f32 %v1666_v21, %v2520_v29  ;;  %v1167_v24 = vmax.f32 %v1065_v19, 0.0 }
 0x284   :  { %v1168_v25 = vmax.f32 %v1068_v22, 0.0  ;;  %v1667_v27 = vpop.f32.mrb[36].mxu0 }
 0x285   :  { %v1668_v13 = vpop.f32.mrb[37].mxu0 }
 0x286   :  { %v1669_v28 = vadd.f32 %v1668_v13, %v1667_v27  ;;  %v1670_v14 = vpop.f32.mrb[38].mxu0  ;;  %v1195_v33 = vpack.c.bf16 %v1168_v25, %v1167_v24 }
 0x287   :  { %v1671_v18 = vpop.f32.mrb[39].mxu0 }
 0x288   :  { %v1073_v23 = vadd.f32 %v1669_v28, %v2520_v29  ;;  %v1672_v34 = vadd.f32 %v1671_v18, %v1670_v14  ;;  %1877 = vmatprep.mubr.bf16.mxu1 %v1195_v33 }
 0x28a   :  { %v1076_v26 = vadd.f32 %v1672_v34, %v2520_v29  ;;  %v1169_v35 = vmax.f32 %v1073_v23, 0.0 }
 0x28c   :  { %v1170_v36 = vmax.f32 %v1076_v26, 0.0  ;;  %v1673_v32 = vpop.f32.mrb[40].mxu0 }
 0x28d   :  { %v1674_v37 = vpop.f32.mrb[41].mxu0 }
 0x28e   :  { %v1675_v38 = vadd.f32 %v1674_v37, %v1673_v32  ;;  %v1676_v39 = vpop.f32.mrb[42].mxu0  ;;  %v1196_v40 = vpack.c.bf16 %v1170_v36, %v1169_v35 }
 0x28f   :  { %v1677_v41 = vpop.f32.mrb[43].mxu0 }
 0x290   :  { %v1081_v42 = vadd.f32 %v1675_v38, %v2520_v29  ;;  %v1678_v43 = vadd.f32 %v1677_v41, %v1676_v39  ;;  %1878 = vmatmul.mubr.bf16.gmra.mrb[56].mxu1 %v1196_v40 }
 0x292   :  { %v1084_v44 = vadd.f32 %v1678_v43, %v2520_v29  ;;  %v1171_v45 = vmax.f32 %v1081_v42, 0.0 }
 0x294   :  { %v1172_v46 = vmax.f32 %v1084_v44, 0.0  ;;  %v1679_v47 = vpop.f32.mrb[44].mxu0 }
 0x295   :  { %v1680_v48 = vpop.f32.mrb[45].mxu0 }
 0x296   :  { %v1681_v49 = vadd.f32 %v1680_v48, %v1679_v47  ;;  %v1682_v50 = vpop.f32.mrb[46].mxu0  ;;  %v1197_v51 = vpack.c.bf16 %v1172_v46, %v1171_v45 }
 0x297   :  { %v1683_v30 = vpop.f32.mrb[47].mxu0 }
 0x298   :  { %v1089_v17 = vadd.f32 %v1681_v49, %v2520_v29  ;;  %v1684_v31 = vadd.f32 %v1683_v30, %v1682_v50  ;;  %1881 = vmatprep.mubr.bf16.mxu1 %v1197_v51 }
 0x29a   :  { %v1092_v20 = vadd.f32 %v1684_v31, %v2520_v29  ;;  %v1173_v12 = vmax.f32 %v1089_v17, 0.0 }
 0x29c   :  { %v1174_v52 = vmax.f32 %v1092_v20, 0.0  ;;  %v1685_v53 = vpop.f32.mrb[48].mxu0 }
 0x29d   :  { %v1686_v54 = vpop.f32.mrb[49].mxu0 }
 0x29e   :  { %v1687_v55 = vadd.f32 %v1686_v54, %v1685_v53  ;;  %v1688_v56 = vpop.f32.mrb[50].mxu0  ;;  %v1198_v57 = vpack.c.bf16 %v1174_v52, %v1173_v12 }
 0x29f   :  { %v1689_v58 = vpop.f32.mrb[51].mxu0 }
 0x2a0   :  { %v1097_v59 = vadd.f32 %v1687_v55, %v2520_v29  ;;  %v1690_v60 = vadd.f32 %v1689_v58, %v1688_v56  ;;  %1882 = vmatmul.mubr.bf16.gmra.mrb[60].mxu1 %v1198_v57 }
 0x2a2   :  { %v1100_v61 = vadd.f32 %v1690_v60, %v2520_v29  ;;  %v1175_v62 = vmax.f32 %v1097_v59, 0.0 }
 0x2a4   :  { %v1176_v63 = vmax.f32 %v1100_v61, 0.0  ;;  %v1691_v0 = vpop.f32.mrb[52].mxu0 }
 0x2a5   :  { %v1692_v1 = vpop.f32.mrb[53].mxu0 }
 0x2a6   :  { %v1693_v2 = vadd.f32 %v1692_v1, %v1691_v0  ;;  %v1694_v3 = vpop.f32.mrb[54].mxu0  ;;  %v1199_v4 = vpack.c.bf16 %v1176_v63, %v1175_v62 }
 0x2a7   :  { %v1695_v5 = vpop.f32.mrb[55].mxu0 }
 0x2a8   :  { %v1105_v6 = vadd.f32 %v1693_v2, %v2520_v29  ;;  %v1696_v7 = vadd.f32 %v1695_v5, %v1694_v3  ;;  %1885 = vmatprep.mubr.bf16.mxu1 %v1199_v4 }
 0x2aa   :  { %v1108_v8 = vadd.f32 %v1696_v7, %v2520_v29  ;;  %v1177_v9 = vmax.f32 %v1105_v6, 0.0 }
 0x2ac   :  { %v1178_v10 = vmax.f32 %v1108_v8, 0.0  ;;  %v1697_v11 = vpop.f32.mrb[56].mxu0 }
 0x2ad   :  { %v1698_v15 = vpop.f32.mrb[57].mxu0 }
 0x2ae   :  { %v1699_v16 = vadd.f32 %v1698_v15, %v1697_v11  ;;  %v1700_v19 = vpop.f32.mrb[58].mxu0  ;;  %v1200_v21 = vpack.c.bf16 %v1178_v10, %v1177_v9 }
 0x2af   :  { %v1701_v22 = vpop.f32.mrb[59].mxu0 }
 0x2b0   :  { %v1113_v24 = vadd.f32 %v1699_v16, %v2520_v29  ;;  %v1702_v25 = vadd.f32 %v1701_v22, %v1700_v19  ;;  %1886 = vmatmul.mubr.bf16.gmra.mrb[64].mxu1 %v1200_v21  ;;  %v2557_v21 = vld [vmem:[%s2693_s6] ss:$0 sm:$0xff] }
 0x2b2   :  { %v1116_v27 = vadd.f32 %v1702_v25, %v2520_v29  ;;  %v1179_v13 = vmax.f32 %v1113_v24, 0.0 }
 0x2b4   :  { %v1180_v28 = vmax.f32 %v1116_v27, 0.0  ;;  %v1703_v14 = vpop.f32.mrb[60].mxu0 }
 0x2b5   :  { %v1704_v33 = vpop.f32.mrb[61].mxu0 }
 0x2b6   :  { %v1705_v18 = vadd.f32 %v1704_v33, %v1703_v14  ;;  %v1706_v23 = vpop.f32.mrb[62].mxu0  ;;  %v1201_v34 = vpack.c.bf16 %v1180_v28, %v1179_v13 }
 0x2b7   :  { %v1707_v26 = vpop.f32.mrb[63].mxu0 }
 0x2b8   :  { %v1121_v35 = vadd.f32 %v1705_v18, %v2520_v29  ;;  %v1708_v36 = vadd.f32 %v1707_v26, %v1706_v23  ;;  %1889 = vmatprep.mubr.bf16.mxu1 %v1201_v34 }
 0x2ba   :  { %v1124_v32 = vadd.f32 %v1708_v36, %v2520_v29  ;;  %v1181_v37 = vmax.f32 %v1121_v35, 0.0 }
 0x2bc   :  { %v1182_v38 = vmax.f32 %v1124_v32, 0.0  ;;  %v1709_v39 = vpop.f32.mrb[64].mxu0 }
 0x2bd   :  { %v1710_v40 = vpop.f32.mrb[65].mxu0 }
 0x2be   :  { %v1711_v41 = vadd.f32 %v1710_v40, %v1709_v39  ;;  %v1712_v42 = vpop.f32.mrb[66].mxu0  ;;  %v1202_v43 = vpack.c.bf16 %v1182_v38, %v1181_v37 }
 0x2bf   :  { %v1713_v44 = vpop.f32.mrb[67].mxu0 }
 0x2c0   :  { %v1129_v45 = vadd.f32 %v1711_v41, %v2520_v29  ;;  %v1714_v46 = vadd.f32 %v1713_v44, %v1712_v42  ;;  %1890 = vmatmul.mubr.bf16.gmra.mrb[68].mxu1 %v1202_v43 }
 0x2c2   :  { %v1132_v47 = vadd.f32 %v1714_v46, %v2520_v29  ;;  %v1183_v48 = vmax.f32 %v1129_v45, 0.0 }
 0x2c4   :  { %v1184_v49 = vmax.f32 %v1132_v47, 0.0  ;;  %v1715_v50 = vpop.f32.mrb[68].mxu0 }
 0x2c5   :  { %v1716_v51 = vpop.f32.mrb[69].mxu0 }
 0x2c6   :  { %v1717_v30 = vadd.f32 %v1716_v51, %v1715_v50  ;;  %v1718_v17 = vpop.f32.mrb[70].mxu0  ;;  %v1203_v31 = vpack.c.bf16 %v1184_v49, %v1183_v48 }
 0x2c7   :  { %v1719_v20 = vpop.f32.mrb[71].mxu0 }
 0x2c8   :  { %v1137_v12 = vadd.f32 %v1717_v30, %v2520_v29  ;;  %v1720_v52 = vadd.f32 %v1719_v20, %v1718_v17  ;;  %1893 = vmatprep.mubr.bf16.mxu1 %v1203_v31 }
 0x2ca   :  { %v1140_v53 = vadd.f32 %v1720_v52, %v2520_v29  ;;  %v1185_v54 = vmax.f32 %v1137_v12, 0.0 }
 0x2cc   :  { %v1186_v55 = vmax.f32 %v1140_v53, 0.0  ;;  %v1721_v56 = vpop.f32.mrb[72].mxu0 }
 0x2cd   :  { %v1722_v57 = vpop.f32.mrb[73].mxu0 }
 0x2ce   :  { %v1723_v58 = vadd.f32 %v1722_v57, %v1721_v56  ;;  %v1724_v59 = vpop.f32.mrb[74].mxu0  ;;  %v1204_v60 = vpack.c.bf16 %v1186_v55, %v1185_v54 }
 0x2cf   :  { %v1725_v61 = vpop.f32.mrb[75].mxu0 }
 0x2d0   :  { %v1145_v62 = vadd.f32 %v1723_v58, %v2520_v29  ;;  %v1726_v63 = vadd.f32 %v1725_v61, %v1724_v59  ;;  %1894 = vmatmul.mubr.bf16.gmra.mrb[72].mxu1 %v1204_v60 }
 0x2d2   :  { %v1148_v0 = vadd.f32 %v1726_v63, %v2520_v29  ;;  %v1187_v1 = vmax.f32 %v1145_v62, 0.0 }
 0x2d4   :  { %v1188_v2 = vmax.f32 %v1148_v0, 0.0  ;;  %v1727_v3 = vpop.f32.mrb[76].mxu0 }
 0x2d5   :  { %v1728_v4 = vpop.f32.mrb[77].mxu0 }
 0x2d6   :  { %v1729_v5 = vadd.f32 %v1728_v4, %v1727_v3  ;;  %v1730_v6 = vpop.f32.mrb[78].mxu0  ;;  %v1205_v7 = vpack.c.bf16 %v1188_v2, %v1187_v1 }
 0x2d7   :  { %v1731_v8 = vpop.f32.mrb[79].mxu0 }
 0x2d8   :  { %v1153_v9 = vadd.f32 %v1729_v5, %v2520_v29  ;;  %v1732_v10 = vadd.f32 %v1731_v8, %v1730_v6  ;;  %1897 = vmatprep.mubr.bf16.mxu1 %v1205_v7 }
 0x2da   :  { %v1156_v11 = vadd.f32 %v1732_v10, %v2520_v29  ;;  %v1189_v15 = vmax.f32 %v1153_v9, 0.0 }
 0x2dc   :  { %v1190_v16 = vmax.f32 %v1156_v11, 0.0 }
 0x2de   :  { %v1206_v19 = vpack.c.bf16 %v1190_v16, %v1189_v15 }
 0x2e0   :  { %1898 = vmatmul.mubr.bf16.gmra.mrb[76].mxu1 %v1206_v19 }
 0x343   :  { %v1871_v22 = vpop.f32.mrb[48].mxu1 }
 0x344   :  { %v1321_v24 = vadd.f32 %v1871_v22, %v2557_v21  ;;  %v1312_v25 = vpop.f32.mrb[49].mxu1 }
 0x345   :  { %v1313_v27 = vadd.f32 %v2557_v21, %v1312_v25  ;;  %v1872_v13 = vpop.f32.mrb[50].mxu1 }
 0x346   :  { %1441 = vst [vmem:[%s2694_s7 + $0x10] sm:$0xff] %v1321_v24  ;;  %v1324_v29 = vadd.f32 %v1872_v13, %v2557_v21  ;;  %v1315_v28 = vpop.f32.mrb[51].mxu1 }
 0x347   :  { %1439 = vst [vmem:[%s2694_s7] sm:$0xff] %v1313_v27  ;;  %v1316_v14 = vadd.f32 %v2557_v21, %v1315_v28 }
 0x348   :  { %1442 = vst [vmem:[%s2694_s7 + $0x18] sm:$0xff] %v1324_v29 }
 0x349   :  { %1440 = vst [vmem:[%s2694_s7 + $0x8] sm:$0xff] %v1316_v14 }
 0x353   :  { %v1875_v33 = vpop.f32.mrb[52].mxu1 }
 0x354   :  { %v1337_v18 = vadd.f32 %v1875_v33, %v2557_v21  ;;  %v1328_v23 = vpop.f32.mrb[53].mxu1 }
 0x355   :  { %v1329_v34 = vadd.f32 %v2557_v21, %v1328_v23  ;;  %v1876_v26 = vpop.f32.mrb[54].mxu1 }
 0x356   :  { %1445 = vst [vmem:[%s2694_s7 + $0x30] sm:$0xff] %v1337_v18  ;;  %v1340_v35 = vadd.f32 %v1876_v26, %v2557_v21  ;;  %v1331_v36 = vpop.f32.mrb[55].mxu1 }
 0x357   :  { %1443 = vst [vmem:[%s2694_s7 + $0x20] sm:$0xff] %v1329_v34  ;;  %v1332_v32 = vadd.f32 %v2557_v21, %v1331_v36 }
 0x358   :  { %1446 = vst [vmem:[%s2694_s7 + $0x38] sm:$0xff] %v1340_v35 }
 0x359   :  { %1444 = vst [vmem:[%s2694_s7 + $0x28] sm:$0xff] %v1332_v32 }
 0x363   :  { %v1879_v37 = vpop.f32.mrb[56].mxu1 }
 0x364   :  { %v1353_v38 = vadd.f32 %v1879_v37, %v2557_v21  ;;  %v1344_v39 = vpop.f32.mrb[57].mxu1 }
 0x365   :  { %v1345_v40 = vadd.f32 %v2557_v21, %v1344_v39  ;;  %v1880_v41 = vpop.f32.mrb[58].mxu1 }
 0x366   :  { %1449 = vst [vmem:[%s2694_s7 + $0x50] sm:$0xff] %v1353_v38  ;;  %v1356_v42 = vadd.f32 %v1880_v41, %v2557_v21  ;;  %v1347_v43 = vpop.f32.mrb[59].mxu1 }
 0x367   :  { %1447 = vst [vmem:[%s2694_s7 + $0x40] sm:$0xff] %v1345_v40  ;;  %v1348_v44 = vadd.f32 %v2557_v21, %v1347_v43 }
 0x368   :  { %1450 = vst [vmem:[%s2694_s7 + $0x58] sm:$0xff] %v1356_v42 }
 0x369   :  { %1448 = vst [vmem:[%s2694_s7 + $0x48] sm:$0xff] %v1348_v44 }
 0x373   :  { %v1883_v45 = vpop.f32.mrb[60].mxu1 }
 0x374   :  { %v1369_v46 = vadd.f32 %v1883_v45, %v2557_v21  ;;  %v1360_v47 = vpop.f32.mrb[61].mxu1 }
 0x375   :  { %v1361_v48 = vadd.f32 %v2557_v21, %v1360_v47  ;;  %v1884_v49 = vpop.f32.mrb[62].mxu1 }
 0x376   :  { %1453 = vst [vmem:[%s2694_s7 + $0x70] sm:$0xff] %v1369_v46  ;;  %v1372_v50 = vadd.f32 %v1884_v49, %v2557_v21  ;;  %v1363_v51 = vpop.f32.mrb[63].mxu1 }
 0x377   :  { %1451 = vst [vmem:[%s2694_s7 + $0x60] sm:$0xff] %v1361_v48  ;;  %v1364_v30 = vadd.f32 %v2557_v21, %v1363_v51 }
 0x378   :  { %1454 = vst [vmem:[%s2694_s7 + $0x78] sm:$0xff] %v1372_v50 }
 0x379   :  { %1452 = vst [vmem:[%s2694_s7 + $0x68] sm:$0xff] %v1364_v30 }
 0x383   :  { %v1887_v17 = vpop.f32.mrb[64].mxu1 }
 0x384   :  { %v1385_v31 = vadd.f32 %v1887_v17, %v2557_v21  ;;  %v1376_v20 = vpop.f32.mrb[65].mxu1 }
 0x385   :  { %v1377_v12 = vadd.f32 %v2557_v21, %v1376_v20  ;;  %v1888_v52 = vpop.f32.mrb[66].mxu1 }
 0x386   :  { %1457 = vst [vmem:[%s2694_s7 + $0x90] sm:$0xff] %v1385_v31  ;;  %v1388_v53 = vadd.f32 %v1888_v52, %v2557_v21  ;;  %v1379_v54 = vpop.f32.mrb[67].mxu1 }
 0x387   :  { %1455 = vst [vmem:[%s2694_s7 + $0x80] sm:$0xff] %v1377_v12  ;;  %v1380_v55 = vadd.f32 %v2557_v21, %v1379_v54 }
 0x388   :  { %1458 = vst [vmem:[%s2694_s7 + $0x98] sm:$0xff] %v1388_v53 }
 0x389   :  { %1456 = vst [vmem:[%s2694_s7 + $0x88] sm:$0xff] %v1380_v55 }
 0x393   :  { %v1891_v56 = vpop.f32.mrb[68].mxu1 }
 0x394   :  { %v1401_v57 = vadd.f32 %v1891_v56, %v2557_v21  ;;  %v1392_v58 = vpop.f32.mrb[69].mxu1 }
 0x395   :  { %v1393_v59 = vadd.f32 %v2557_v21, %v1392_v58  ;;  %v1892_v60 = vpop.f32.mrb[70].mxu1 }
 0x396   :  { %1461 = vst [vmem:[%s2694_s7 + $0xb0] sm:$0xff] %v1401_v57  ;;  %v1404_v61 = vadd.f32 %v1892_v60, %v2557_v21  ;;  %v1395_v62 = vpop.f32.mrb[71].mxu1 }
 0x397   :  { %1459 = vst [vmem:[%s2694_s7 + $0xa0] sm:$0xff] %v1393_v59  ;;  %v1396_v63 = vadd.f32 %v2557_v21, %v1395_v62 }
 0x398   :  { %1462 = vst [vmem:[%s2694_s7 + $0xb8] sm:$0xff] %v1404_v61 }
 0x399   :  { %1460 = vst [vmem:[%s2694_s7 + $0xa8] sm:$0xff] %v1396_v63 }
 0x3a3   :  { %v1895_v0 = vpop.f32.mrb[72].mxu1 }
 0x3a4   :  { %v1417_v1 = vadd.f32 %v1895_v0, %v2557_v21  ;;  %v1408_v2 = vpop.f32.mrb[73].mxu1 }
 0x3a5   :  { %v1409_v3 = vadd.f32 %v2557_v21, %v1408_v2  ;;  %v1896_v4 = vpop.f32.mrb[74].mxu1 }
 0x3a6   :  { %1465 = vst [vmem:[%s2694_s7 + $0xd0] sm:$0xff] %v1417_v1  ;;  %v1420_v5 = vadd.f32 %v1896_v4, %v2557_v21  ;;  %v1411_v6 = vpop.f32.mrb[75].mxu1 }
 0x3a7   :  { %1463 = vst [vmem:[%s2694_s7 + $0xc0] sm:$0xff] %v1409_v3  ;;  %v1412_v7 = vadd.f32 %v2557_v21, %v1411_v6 }
 0x3a8   :  { %1466 = vst [vmem:[%s2694_s7 + $0xd8] sm:$0xff] %v1420_v5 }
 0x3a9   :  { %1464 = vst [vmem:[%s2694_s7 + $0xc8] sm:$0xff] %v1412_v7 }
 0x3b3   :  { %v1899_v8 = vpop.f32.mrb[76].mxu1 }
 0x3b4   :  { %v1433_v9 = vadd.f32 %v1899_v8, %v2557_v21  ;;  %v1424_v10 = vpop.f32.mrb[77].mxu1 }
 0x3b5   :  { %v1425_v11 = vadd.f32 %v2557_v21, %v1424_v10  ;;  %v1900_v15 = vpop.f32.mrb[78].mxu1 }
 0x3b6   :  { %1469 = vst [vmem:[%s2694_s7 + $0xf0] sm:$0xff] %v1433_v9  ;;  %v1436_v16 = vadd.f32 %v1900_v15, %v2557_v21  ;;  %v1427_v19 = vpop.f32.mrb[79].mxu1 }
 0x3b7   :  { %1467 = vst [vmem:[%s2694_s7 + $0xe0] sm:$0xff] %v1425_v11  ;;  %v1428_v22 = vadd.f32 %v2557_v21, %v1427_v19 }
 0x3b8   :  { %1470 = vst [vmem:[%s2694_s7 + $0xf8] sm:$0xff] %v1436_v16 }
 0x3b9   :  { %1468 = vst [vmem:[%s2694_s7 + $0xe8] sm:$0xff] %v1428_v22 }

</bundles_post_ra>
